<compile_context>
chip_gen: v5e
topology: v5e:2x2
jax: 0.10.0
libtpu: 0.0.40
codegen_flags: <defaults>
</compile_context>

<pallas_src>
import functools

import jax
import jax.numpy as jnp
from jax import lax
from jax.experimental import pallas as pl
from jax.experimental.pallas import tpu as pltpu


# ---------------------------------------------------------------------------
# Packed-weight layout: one (rows, 4H) f32 buffer, 8-row aligned sections.
# ---------------------------------------------------------------------------
def _pad8(n):
    return -(-n // 8) * 8


def _pack_layout(num_layers, H, d_in):
    offs = {}
    r = 0
    offs["w_ih_0"] = r; r += _pad8(d_in)          # (d_in, 4H)
    offs["w_hh_0"] = r; r += _pad8(H)             # (H, 4H)
    offs["b_0"] = r; r += 8                        # (1, 4H)
    for l in range(1, num_layers):
        offs[f"w_l{l}"] = r; r += _pad8(2 * H)     # stacked [W_ih_l.T ; W_hh_l.T]
        offs[f"b_{l}"] = r; r += 8
    offs["w_out"] = r                              # row: lanes [0:H) valid
    offs["b_out"] = r + 1                          # row: lane 0 valid
    r += 8
    return offs, r


# ---------------------------------------------------------------------------
# Fused Pallas kernel: num_layers LSTM (wavefront) + score head, single
# program, no grid, everything resident in VMEM/vregs.
# ---------------------------------------------------------------------------
def make_fused_kernel(num_layers, T, N, H, d_in, offs):
    def lstm_cell(gates, c_prev):
        # gates is one full (N, 4H) = (8,128) f32 vreg: 2 full-vreg EUP passes,
        # the i/f/g/o lane slices below are free.
        sig = jax.nn.sigmoid(gates)
        th = jnp.tanh(gates)
        i_g = sig[:, 0 * H:1 * H]
        f_g = sig[:, 1 * H:2 * H]
        g_g = th[:, 2 * H:3 * H]
        o_g = sig[:, 3 * H:4 * H]
        c_new = f_g * c_prev + i_g * g_g
        h_new = o_g * jnp.tanh(c_new)
        return h_new, c_new

    def kernel(x_ref, h0_ref, w_ref, score_ref):
        h0 = h0_ref[...]                                         # (N, H) == c0

        # ---- unpack parameters from the single packed buffer (static slices)
        r = offs["w_ih_0"]; w_ih0 = w_ref[r:r + d_in, :]         # (d_in, 4H)
        r = offs["w_hh_0"]; w_hh0 = w_ref[r:r + H, :]            # (H, 4H)
        r = offs["b_0"];    b0 = w_ref[r:r + 1, :]               # (1, 4H)
        rhs_up, b_up = [], []
        for l in range(1, num_layers):
            r = offs[f"w_l{l}"]; rhs_up.append(w_ref[r:r + 2 * H, :])  # (2H, 4H)
            r = offs[f"b_{l}"];  b_up.append(w_ref[r:r + 1, :])        # (1, 4H)

        # ---- layer-0 input projection hoisted off the serial chain:
        # one batched (T*N, d_in) @ (d_in, 4H) matmul, bias folded in.
        xw0 = jnp.dot(x_ref[...], w_ih0,
                      preferred_element_type=jnp.float32) + b0   # (T*N, 4H)

        # ---- wavefront over time: layer l step t right after layer l-1
        # step t; layer-1 work overlaps layer-0 step t+1 under the scheduler.
        h = [h0] * num_layers
        c = [h0] * num_layers
        for t in range(T):
            # layer 0: only the recurrent h @ W_hh matmul is on the chain.
            g0 = xw0[t * N:(t + 1) * N, :] + jnp.dot(
                h[0], w_hh0, preferred_element_type=jnp.float32)  # (N, 4H)
            h[0], c[0] = lstm_cell(g0, c[0])
            # layers >= 1: fused input+recurrent matmul, one MXU push/step.
            for l in range(1, num_layers):
                lhs = jnp.concatenate([h[l - 1], h[l]], axis=1)   # (N, 2H)
                gl = jnp.dot(lhs, rhs_up[l - 1],
                             preferred_element_type=jnp.float32) + b_up[l - 1]
                h[l], c[l] = lstm_cell(gl, c[l])

        # ---- score head: VPU multiply + XLU lane reduce, no MXU tail.
        r = offs["w_out"]
        w_row = w_ref[r:r + 1, 0:H]                               # (1, H)
        r = offs["b_out"]
        b_out = w_ref[r:r + 1, 0:1]                               # (1, 1)
        score_ref[...] = (jnp.sum(h[num_layers - 1] * w_row, axis=-1,
                                  keepdims=True) + b_out)

    return kernel


# ---------------------------------------------------------------------------
# Parameter prep (done ONCE, outside the jitted forward): pre-transpose
# weights, pre-sum biases, pack everything into one (rows, 4H) f32 buffer.
# ---------------------------------------------------------------------------
def prepare_params(params, num_layers):
    H = params["w_hh_0"].shape[1]
    d_in = params["w_ih_0"].shape[1]
    G = 4 * H
    offs, rows = _pack_layout(num_layers, H, d_in)

    W = jnp.zeros((rows, G), jnp.float32)
    W = W.at[offs["w_ih_0"]:offs["w_ih_0"] + d_in, :].set(
        jnp.asarray(params["w_ih_0"], jnp.float32).T)
    W = W.at[offs["w_hh_0"]:offs["w_hh_0"] + H, :].set(
        jnp.asarray(params["w_hh_0"], jnp.float32).T)
    W = W.at[offs["b_0"], :].set(
        jnp.asarray(params["b_ih_0"] + params["b_hh_0"], jnp.float32))
    for l in range(1, num_layers):
        r = offs[f"w_l{l}"]
        W = W.at[r:r + H, :].set(jnp.asarray(params[f"w_ih_{l}"], jnp.float32).T)
        W = W.at[r + H:r + 2 * H, :].set(
            jnp.asarray(params[f"w_hh_{l}"], jnp.float32).T)
        W = W.at[offs[f"b_{l}"], :].set(
            jnp.asarray(params[f"b_ih_{l}"] + params[f"b_hh_{l}"], jnp.float32))
    W = W.at[offs["w_out"], 0:H].set(
        jnp.asarray(params["w_out"], jnp.float32).reshape(-1))
    W = W.at[offs["b_out"], 0].set(
        jnp.asarray(params["b_out"], jnp.float32).reshape(-1)[0])
    return {"W_packed": W}


# ---------------------------------------------------------------------------
# TrajectoryEvaluator forward (single fused pallas_call, 3 input DMAs)
# ---------------------------------------------------------------------------
@functools.partial(jax.jit, static_argnames=("num_layers",))
def trajectory_evaluator_forward(prep, obs_feature, candidate_trajectory,
                                 intention_label, *, num_layers):
    bs = obs_feature.shape[0]
    n_traj = candidate_trajectory.shape[0]
    k = n_traj // bs
    T = candidate_trajectory.shape[1]
    d_in = candidate_trajectory.shape[2]
    H = prep["W_packed"].shape[1] // 4

    # intention_label.repeat(bs, 1); cat with obs_feature; repeat each row k
    # times (these fuse into a single tiny XLA fusion on (8,32) data).
    intention = jnp.broadcast_to(intention_label,
                                 (bs, intention_label.shape[1]))
    combined = jnp.concatenate([obs_feature, intention], axis=-1)   # (bs, H)
    combined = jnp.repeat(combined, k, axis=0)                      # (N, H)

    # Time-major flattened input: row index = t*N + n.
    x_flat = jnp.transpose(candidate_trajectory, (1, 0, 2)).reshape(
        T * n_traj, d_in)

    offs, _ = _pack_layout(num_layers, H, d_in)

    vmem = pl.BlockSpec(memory_space=pltpu.MemorySpace.VMEM)
    score = pl.pallas_call(
        make_fused_kernel(num_layers, T, n_traj, H, d_in, offs),
        out_shape=jax.ShapeDtypeStruct((n_traj, 1), jnp.float32),
        in_specs=[vmem, vmem, vmem],
        out_specs=vmem,
    )(x_flat.astype(jnp.float32), combined.astype(jnp.float32),
      prep["W_packed"])
    return score


# ---------------------------------------------------------------------------
# Pure-JAX reference (for verification)
# ---------------------------------------------------------------------------
def reference_forward(params, obs_feature, candidate_trajectory,
                      intention_label, num_layers):
    bs = obs_feature.shape[0]
    n_traj = candidate_trajectory.shape[0]
    k = n_traj // bs
    intention = jnp.broadcast_to(intention_label, (bs, intention_label.shape[1]))
    combined = jnp.concatenate([obs_feature, intention], axis=-1)
    combined = jnp.repeat(combined, k, axis=0)

    seq = jnp.transpose(candidate_trajectory, (1, 0, 2))  # (T, N, D)
    for layer in range(num_layers):
        w_ih = params[f"w_ih_{layer}"]
        w_hh = params[f"w_hh_{layer}"]
        b = params[f"b_ih_{layer}"] + params[f"b_hh_{layer}"]
        H = w_hh.shape[1]

        def step(carry, x_t, w_ih=w_ih, w_hh=w_hh, b=b, H=H):
            h, c = carry
            gates = x_t @ w_ih.T + h @ w_hh.T + b
            i_g = jax.nn.sigmoid(gates[:, :H])
            f_g = jax.nn.sigmoid(gates[:, H:2 * H])
            g_g = jnp.tanh(gates[:, 2 * H:3 * H])
            o_g = jax.nn.sigmoid(gates[:, 3 * H:])
            c2 = f_g * c + i_g * g_g
            h2 = o_g * jnp.tanh(c2)
            return (h2, c2), h2

        (_, _), seq = lax.scan(step, (combined, combined), seq)

    h_last = seq[-1]
    return h_last @ params["w_out"].T + params["b_out"]


# ---------------------------------------------------------------------------
# Main
# ---------------------------------------------------------------------------
if __name__ == "__main__":
    # Module hyper-parameters.
    input_size = 2          # candidate trajectory is (x, y) per step
    hidden_size = 29        # LSTM hidden = hidden_size + 3 = 32
    num_layers = 2
    H = hidden_size + 3

    # Problem sizes.
    bs = 2                  # number of observed vehicles
    k_cand = 4              # candidates per vehicle
    n_traj = bs * k_cand    # 8 candidate trajectories
    pred_len = 8

    key = jax.random.PRNGKey(0)
    k_obs, k_traj, k_int, k_par = jax.random.split(key, 4)

    obs_feature = jax.random.normal(k_obs, (bs, hidden_size), jnp.float32)
    candidate_trajectory = jax.random.normal(
        k_traj, (n_traj, pred_len, input_size), jnp.float32)
    intention_label = jax.random.normal(k_int, (1, 3), jnp.float32)

    # Deterministic parameter init (PyTorch-style uniform(-1/sqrt(H), 1/sqrt(H))).
    stdv = 1.0 / (H ** 0.5)
    params = {}
    pkeys = jax.random.split(k_par, 4 * num_layers + 2)
    idx = 0
    for layer in range(num_layers):
        d_in = input_size if layer == 0 else H
        params[f"w_ih_{layer}"] = jax.random.uniform(
            pkeys[idx], (4 * H, d_in), jnp.float32, -stdv, stdv); idx += 1
        params[f"w_hh_{layer}"] = jax.random.uniform(
            pkeys[idx], (4 * H, H), jnp.float32, -stdv, stdv); idx += 1
        params[f"b_ih_{layer}"] = jax.random.uniform(
            pkeys[idx], (4 * H,), jnp.float32, -stdv, stdv); idx += 1
        params[f"b_hh_{layer}"] = jax.random.uniform(
            pkeys[idx], (4 * H,), jnp.float32, -stdv, stdv); idx += 1
    params["w_out"] = jax.random.uniform(
        pkeys[idx], (1, H), jnp.float32, -stdv, stdv); idx += 1
    params["b_out"] = jax.random.uniform(
        pkeys[idx], (1,), jnp.float32, -stdv, stdv)

    # Pack / pre-transpose / pre-sum once, outside the jitted forward.
    prep = prepare_params(params, num_layers)

    score = trajectory_evaluator_forward(
        prep, obs_feature, candidate_trajectory, intention_label,
        num_layers=num_layers)
    score = jax.block_until_ready(score)

    ref = reference_forward(params, obs_feature, candidate_trajectory,
                            intention_label, num_layers)
    ref = jax.block_until_ready(ref)

    assert score.shape == (n_traj, 1)
    # Both sides are f32 (module spec is f64); tolerance covers f32 matmul
    # reassociation between the fused kernel and the XLA reference.
    assert jnp.allclose(score, ref, rtol=1e-3, atol=1e-3), (score, ref)
    print("KERNEL_OK")
</pallas_src>

<mosaic_0001>
module attributes {stable_mosaic.version = 11 : i64} {
  func.func @kernel(%arg0: memref<64x2xf32, #tpu.memory_space<vmem>>, %arg1: memref<8x32xf32, #tpu.memory_space<vmem>>, %arg2: memref<128x128xf32, #tpu.memory_space<vmem>>, %arg3: memref<8x1xf32, #tpu.memory_space<vmem>>) attributes {dimension_semantics = [], scalar_prefetch = 0 : i64, scratch_operands = 0 : i64, tpu.core_type = #tpu.core_type<tc>} {
    %c0 = arith.constant 0 : index
    %c0_0 = arith.constant 0 : index
    %0 = vector.load %arg1[%c0, %c0_0] : memref<8x32xf32, #tpu.memory_space<vmem>>, vector<8x32xf32>
    %c0_1 = arith.constant 0 : index
    %c0_2 = arith.constant 0 : index
    %1 = vector.load %arg2[%c0_1, %c0_2] : memref<128x128xf32, #tpu.memory_space<vmem>>, vector<2x128xf32>
    %c8 = arith.constant 8 : index
    %c0_3 = arith.constant 0 : index
    %2 = vector.load %arg2[%c8, %c0_3] : memref<128x128xf32, #tpu.memory_space<vmem>>, vector<32x128xf32>
    %c40 = arith.constant 40 : index
    %c0_4 = arith.constant 0 : index
    %3 = vector.load %arg2[%c40, %c0_4] : memref<128x128xf32, #tpu.memory_space<vmem>>, vector<1x128xf32>
    %c48 = arith.constant 48 : index
    %c0_5 = arith.constant 0 : index
    %4 = vector.load %arg2[%c48, %c0_5] : memref<128x128xf32, #tpu.memory_space<vmem>>, vector<64x128xf32>
    %c112 = arith.constant 112 : index
    %c0_6 = arith.constant 0 : index
    %5 = vector.load %arg2[%c112, %c0_6] : memref<128x128xf32, #tpu.memory_space<vmem>>, vector<1x128xf32>
    %c0_7 = arith.constant 0 : index
    %c0_8 = arith.constant 0 : index
    %6 = vector.load %arg0[%c0_7, %c0_8] : memref<64x2xf32, #tpu.memory_space<vmem>>, vector<64x2xf32>
    %cst = arith.constant dense<0.000000e+00> : vector<64x128xf32>
    %7 = tpu.matmul %6, %1, %cst {dimension_numbers = #tpu.dot_dimension_numbers<[1], [0], [0], [1], [0, 0, 1, 1], [], []>} : vector<64x2xf32>, vector<2x128xf32>, vector<64x128xf32> -> vector<64x128xf32>
    %8 = vector.broadcast %3 : vector<1x128xf32> to vector<64x128xf32>
    %9 = arith.addf %7, %8 : vector<64x128xf32>
    %10 = vector.extract_strided_slice %9 {offsets = [0, 0], sizes = [8, 128], strides = [1, 1]} : vector<64x128xf32> to vector<8x128xf32>
    %cst_9 = arith.constant dense<0.000000e+00> : vector<8x128xf32>
    %11 = tpu.matmul %0, %2, %cst_9 {dimension_numbers = #tpu.dot_dimension_numbers<[1], [0], [0], [1], [0, 0, 1, 1], [], []>} : vector<8x32xf32>, vector<32x128xf32>, vector<8x128xf32> -> vector<8x128xf32>
    %12 = arith.addf %10, %11 : vector<8x128xf32>
    %13 = arith.negf %12 : vector<8x128xf32>
    %14 = math.exp %13 : vector<8x128xf32>
    %cst_10 = arith.constant 1.000000e+00 : f32
    %15 = vector.broadcast %cst_10 : f32 to vector<8x128xf32>
    %16 = arith.addf %15, %14 : vector<8x128xf32>
    %17 = arith.divf %15, %16 : vector<8x128xf32>
    %18 = math.tanh %12 : vector<8x128xf32>
    %19 = vector.extract_strided_slice %17 {offsets = [0, 0], sizes = [8, 32], strides = [1, 1]} : vector<8x128xf32> to vector<8x32xf32>
    %20 = vector.extract_strided_slice %17 {offsets = [0, 32], sizes = [8, 32], strides = [1, 1]} : vector<8x128xf32> to vector<8x32xf32>
    %21 = vector.extract_strided_slice %18 {offsets = [0, 64], sizes = [8, 32], strides = [1, 1]} : vector<8x128xf32> to vector<8x32xf32>
    %22 = vector.extract_strided_slice %17 {offsets = [0, 96], sizes = [8, 32], strides = [1, 1]} : vector<8x128xf32> to vector<8x32xf32>
    %23 = arith.mulf %20, %0 : vector<8x32xf32>
    %24 = arith.mulf %19, %21 : vector<8x32xf32>
    %25 = arith.addf %23, %24 : vector<8x32xf32>
    %26 = math.tanh %25 : vector<8x32xf32>
    %27 = arith.mulf %22, %26 : vector<8x32xf32>
    %28 = tpu.concatenate %27, %0 in 1 : vector<8x32xf32>, vector<8x32xf32> -> vector<8x64xf32>
    %cst_11 = arith.constant dense<0.000000e+00> : vector<8x128xf32>
    %29 = tpu.matmul %28, %4, %cst_11 {dimension_numbers = #tpu.dot_dimension_numbers<[1], [0], [0], [1], [0, 0, 1, 1], [], []>} : vector<8x64xf32>, vector<64x128xf32>, vector<8x128xf32> -> vector<8x128xf32>
    %30 = vector.broadcast %5 : vector<1x128xf32> to vector<8x128xf32>
    %31 = arith.addf %29, %30 : vector<8x128xf32>
    %32 = arith.negf %31 : vector<8x128xf32>
    %33 = math.exp %32 : vector<8x128xf32>
    %cst_12 = arith.constant 1.000000e+00 : f32
    %34 = vector.broadcast %cst_12 : f32 to vector<8x128xf32>
    %35 = arith.addf %34, %33 : vector<8x128xf32>
    %36 = arith.divf %34, %35 : vector<8x128xf32>
    %37 = math.tanh %31 : vector<8x128xf32>
    %38 = vector.extract_strided_slice %36 {offsets = [0, 0], sizes = [8, 32], strides = [1, 1]} : vector<8x128xf32> to vector<8x32xf32>
    %39 = vector.extract_strided_slice %36 {offsets = [0, 32], sizes = [8, 32], strides = [1, 1]} : vector<8x128xf32> to vector<8x32xf32>
    %40 = vector.extract_strided_slice %37 {offsets = [0, 64], sizes = [8, 32], strides = [1, 1]} : vector<8x128xf32> to vector<8x32xf32>
    %41 = vector.extract_strided_slice %36 {offsets = [0, 96], sizes = [8, 32], strides = [1, 1]} : vector<8x128xf32> to vector<8x32xf32>
    %42 = arith.mulf %39, %0 : vector<8x32xf32>
    %43 = arith.mulf %38, %40 : vector<8x32xf32>
    %44 = arith.addf %42, %43 : vector<8x32xf32>
    %45 = math.tanh %44 : vector<8x32xf32>
    %46 = arith.mulf %41, %45 : vector<8x32xf32>
    %47 = vector.extract_strided_slice %9 {offsets = [8, 0], sizes = [8, 128], strides = [1, 1]} : vector<64x128xf32> to vector<8x128xf32>
    %cst_13 = arith.constant dense<0.000000e+00> : vector<8x128xf32>
    %48 = tpu.matmul %27, %2, %cst_13 {dimension_numbers = #tpu.dot_dimension_numbers<[1], [0], [0], [1], [0, 0, 1, 1], [], []>} : vector<8x32xf32>, vector<32x128xf32>, vector<8x128xf32> -> vector<8x128xf32>
    %49 = arith.addf %47, %48 : vector<8x128xf32>
    %50 = arith.negf %49 : vector<8x128xf32>
    %51 = math.exp %50 : vector<8x128xf32>
    %cst_14 = arith.constant 1.000000e+00 : f32
    %52 = vector.broadcast %cst_14 : f32 to vector<8x128xf32>
    %53 = arith.addf %52, %51 : vector<8x128xf32>
    %54 = arith.divf %52, %53 : vector<8x128xf32>
    %55 = math.tanh %49 : vector<8x128xf32>
    %56 = vector.extract_strided_slice %54 {offsets = [0, 0], sizes = [8, 32], strides = [1, 1]} : vector<8x128xf32> to vector<8x32xf32>
    %57 = vector.extract_strided_slice %54 {offsets = [0, 32], sizes = [8, 32], strides = [1, 1]} : vector<8x128xf32> to vector<8x32xf32>
    %58 = vector.extract_strided_slice %55 {offsets = [0, 64], sizes = [8, 32], strides = [1, 1]} : vector<8x128xf32> to vector<8x32xf32>
    %59 = vector.extract_strided_slice %54 {offsets = [0, 96], sizes = [8, 32], strides = [1, 1]} : vector<8x128xf32> to vector<8x32xf32>
    %60 = arith.mulf %57, %25 : vector<8x32xf32>
    %61 = arith.mulf %56, %58 : vector<8x32xf32>
    %62 = arith.addf %60, %61 : vector<8x32xf32>
    %63 = math.tanh %62 : vector<8x32xf32>
    %64 = arith.mulf %59, %63 : vector<8x32xf32>
    %65 = tpu.concatenate %64, %46 in 1 : vector<8x32xf32>, vector<8x32xf32> -> vector<8x64xf32>
    %cst_15 = arith.constant dense<0.000000e+00> : vector<8x128xf32>
    %66 = tpu.matmul %65, %4, %cst_15 {dimension_numbers = #tpu.dot_dimension_numbers<[1], [0], [0], [1], [0, 0, 1, 1], [], []>} : vector<8x64xf32>, vector<64x128xf32>, vector<8x128xf32> -> vector<8x128xf32>
    %67 = vector.broadcast %5 : vector<1x128xf32> to vector<8x128xf32>
    %68 = arith.addf %66, %67 : vector<8x128xf32>
    %69 = arith.negf %68 : vector<8x128xf32>
    %70 = math.exp %69 : vector<8x128xf32>
    %cst_16 = arith.constant 1.000000e+00 : f32
    %71 = vector.broadcast %cst_16 : f32 to vector<8x128xf32>
    %72 = arith.addf %71, %70 : vector<8x128xf32>
    %73 = arith.divf %71, %72 : vector<8x128xf32>
    %74 = math.tanh %68 : vector<8x128xf32>
    %75 = vector.extract_strided_slice %73 {offsets = [0, 0], sizes = [8, 32], strides = [1, 1]} : vector<8x128xf32> to vector<8x32xf32>
    %76 = vector.extract_strided_slice %73 {offsets = [0, 32], sizes = [8, 32], strides = [1, 1]} : vector<8x128xf32> to vector<8x32xf32>
    %77 = vector.extract_strided_slice %74 {offsets = [0, 64], sizes = [8, 32], strides = [1, 1]} : vector<8x128xf32> to vector<8x32xf32>
    %78 = vector.extract_strided_slice %73 {offsets = [0, 96], sizes = [8, 32], strides = [1, 1]} : vector<8x128xf32> to vector<8x32xf32>
    %79 = arith.mulf %76, %44 : vector<8x32xf32>
    %80 = arith.mulf %75, %77 : vector<8x32xf32>
    %81 = arith.addf %79, %80 : vector<8x32xf32>
    %82 = math.tanh %81 : vector<8x32xf32>
    %83 = arith.mulf %78, %82 : vector<8x32xf32>
    %84 = vector.extract_strided_slice %9 {offsets = [16, 0], sizes = [8, 128], strides = [1, 1]} : vector<64x128xf32> to vector<8x128xf32>
    %cst_17 = arith.constant dense<0.000000e+00> : vector<8x128xf32>
    %85 = tpu.matmul %64, %2, %cst_17 {dimension_numbers = #tpu.dot_dimension_numbers<[1], [0], [0], [1], [0, 0, 1, 1], [], []>} : vector<8x32xf32>, vector<32x128xf32>, vector<8x128xf32> -> vector<8x128xf32>
    %86 = arith.addf %84, %85 : vector<8x128xf32>
    %87 = arith.negf %86 : vector<8x128xf32>
    %88 = math.exp %87 : vector<8x128xf32>
    %cst_18 = arith.constant 1.000000e+00 : f32
    %89 = vector.broadcast %cst_18 : f32 to vector<8x128xf32>
    %90 = arith.addf %89, %88 : vector<8x128xf32>
    %91 = arith.divf %89, %90 : vector<8x128xf32>
    %92 = math.tanh %86 : vector<8x128xf32>
    %93 = vector.extract_strided_slice %91 {offsets = [0, 0], sizes = [8, 32], strides = [1, 1]} : vector<8x128xf32> to vector<8x32xf32>
    %94 = vector.extract_strided_slice %91 {offsets = [0, 32], sizes = [8, 32], strides = [1, 1]} : vector<8x128xf32> to vector<8x32xf32>
    %95 = vector.extract_strided_slice %92 {offsets = [0, 64], sizes = [8, 32], strides = [1, 1]} : vector<8x128xf32> to vector<8x32xf32>
    %96 = vector.extract_strided_slice %91 {offsets = [0, 96], sizes = [8, 32], strides = [1, 1]} : vector<8x128xf32> to vector<8x32xf32>
    %97 = arith.mulf %94, %62 : vector<8x32xf32>
    %98 = arith.mulf %93, %95 : vector<8x32xf32>
    %99 = arith.addf %97, %98 : vector<8x32xf32>
    %100 = math.tanh %99 : vector<8x32xf32>
    %101 = arith.mulf %96, %100 : vector<8x32xf32>
    %102 = tpu.concatenate %101, %83 in 1 : vector<8x32xf32>, vector<8x32xf32> -> vector<8x64xf32>
    %cst_19 = arith.constant dense<0.000000e+00> : vector<8x128xf32>
    %103 = tpu.matmul %102, %4, %cst_19 {dimension_numbers = #tpu.dot_dimension_numbers<[1], [0], [0], [1], [0, 0, 1, 1], [], []>} : vector<8x64xf32>, vector<64x128xf32>, vector<8x128xf32> -> vector<8x128xf32>
    %104 = vector.broadcast %5 : vector<1x128xf32> to vector<8x128xf32>
    %105 = arith.addf %103, %104 : vector<8x128xf32>
    %106 = arith.negf %105 : vector<8x128xf32>
    %107 = math.exp %106 : vector<8x128xf32>
    %cst_20 = arith.constant 1.000000e+00 : f32
    %108 = vector.broadcast %cst_20 : f32 to vector<8x128xf32>
    %109 = arith.addf %108, %107 : vector<8x128xf32>
    %110 = arith.divf %108, %109 : vector<8x128xf32>
    %111 = math.tanh %105 : vector<8x128xf32>
    %112 = vector.extract_strided_slice %110 {offsets = [0, 0], sizes = [8, 32], strides = [1, 1]} : vector<8x128xf32> to vector<8x32xf32>
    %113 = vector.extract_strided_slice %110 {offsets = [0, 32], sizes = [8, 32], strides = [1, 1]} : vector<8x128xf32> to vector<8x32xf32>
    %114 = vector.extract_strided_slice %111 {offsets = [0, 64], sizes = [8, 32], strides = [1, 1]} : vector<8x128xf32> to vector<8x32xf32>
    %115 = vector.extract_strided_slice %110 {offsets = [0, 96], sizes = [8, 32], strides = [1, 1]} : vector<8x128xf32> to vector<8x32xf32>
    %116 = arith.mulf %113, %81 : vector<8x32xf32>
    %117 = arith.mulf %112, %114 : vector<8x32xf32>
    %118 = arith.addf %116, %117 : vector<8x32xf32>
    %119 = math.tanh %118 : vector<8x32xf32>
    %120 = arith.mulf %115, %119 : vector<8x32xf32>
    %121 = vector.extract_strided_slice %9 {offsets = [24, 0], sizes = [8, 128], strides = [1, 1]} : vector<64x128xf32> to vector<8x128xf32>
    %cst_21 = arith.constant dense<0.000000e+00> : vector<8x128xf32>
    %122 = tpu.matmul %101, %2, %cst_21 {dimension_numbers = #tpu.dot_dimension_numbers<[1], [0], [0], [1], [0, 0, 1, 1], [], []>} : vector<8x32xf32>, vector<32x128xf32>, vector<8x128xf32> -> vector<8x128xf32>
    %123 = arith.addf %121, %122 : vector<8x128xf32>
    %124 = arith.negf %123 : vector<8x128xf32>
    %125 = math.exp %124 : vector<8x128xf32>
    %cst_22 = arith.constant 1.000000e+00 : f32
    %126 = vector.broadcast %cst_22 : f32 to vector<8x128xf32>
    %127 = arith.addf %126, %125 : vector<8x128xf32>
    %128 = arith.divf %126, %127 : vector<8x128xf32>
    %129 = math.tanh %123 : vector<8x128xf32>
    %130 = vector.extract_strided_slice %128 {offsets = [0, 0], sizes = [8, 32], strides = [1, 1]} : vector<8x128xf32> to vector<8x32xf32>
    %131 = vector.extract_strided_slice %128 {offsets = [0, 32], sizes = [8, 32], strides = [1, 1]} : vector<8x128xf32> to vector<8x32xf32>
    %132 = vector.extract_strided_slice %129 {offsets = [0, 64], sizes = [8, 32], strides = [1, 1]} : vector<8x128xf32> to vector<8x32xf32>
    %133 = vector.extract_strided_slice %128 {offsets = [0, 96], sizes = [8, 32], strides = [1, 1]} : vector<8x128xf32> to vector<8x32xf32>
    %134 = arith.mulf %131, %99 : vector<8x32xf32>
    %135 = arith.mulf %130, %132 : vector<8x32xf32>
    %136 = arith.addf %134, %135 : vector<8x32xf32>
    %137 = math.tanh %136 : vector<8x32xf32>
    %138 = arith.mulf %133, %137 : vector<8x32xf32>
    %139 = tpu.concatenate %138, %120 in 1 : vector<8x32xf32>, vector<8x32xf32> -> vector<8x64xf32>
    %cst_23 = arith.constant dense<0.000000e+00> : vector<8x128xf32>
    %140 = tpu.matmul %139, %4, %cst_23 {dimension_numbers = #tpu.dot_dimension_numbers<[1], [0], [0], [1], [0, 0, 1, 1], [], []>} : vector<8x64xf32>, vector<64x128xf32>, vector<8x128xf32> -> vector<8x128xf32>
    %141 = vector.broadcast %5 : vector<1x128xf32> to vector<8x128xf32>
    %142 = arith.addf %140, %141 : vector<8x128xf32>
    %143 = arith.negf %142 : vector<8x128xf32>
    %144 = math.exp %143 : vector<8x128xf32>
    %cst_24 = arith.constant 1.000000e+00 : f32
    %145 = vector.broadcast %cst_24 : f32 to vector<8x128xf32>
    %146 = arith.addf %145, %144 : vector<8x128xf32>
    %147 = arith.divf %145, %146 : vector<8x128xf32>
    %148 = math.tanh %142 : vector<8x128xf32>
    %149 = vector.extract_strided_slice %147 {offsets = [0, 0], sizes = [8, 32], strides = [1, 1]} : vector<8x128xf32> to vector<8x32xf32>
    %150 = vector.extract_strided_slice %147 {offsets = [0, 32], sizes = [8, 32], strides = [1, 1]} : vector<8x128xf32> to vector<8x32xf32>
    %151 = vector.extract_strided_slice %148 {offsets = [0, 64], sizes = [8, 32], strides = [1, 1]} : vector<8x128xf32> to vector<8x32xf32>
    %152 = vector.extract_strided_slice %147 {offsets = [0, 96], sizes = [8, 32], strides = [1, 1]} : vector<8x128xf32> to vector<8x32xf32>
    %153 = arith.mulf %150, %118 : vector<8x32xf32>
    %154 = arith.mulf %149, %151 : vector<8x32xf32>
    %155 = arith.addf %153, %154 : vector<8x32xf32>
    %156 = math.tanh %155 : vector<8x32xf32>
    %157 = arith.mulf %152, %156 : vector<8x32xf32>
    %158 = vector.extract_strided_slice %9 {offsets = [32, 0], sizes = [8, 128], strides = [1, 1]} : vector<64x128xf32> to vector<8x128xf32>
    %cst_25 = arith.constant dense<0.000000e+00> : vector<8x128xf32>
    %159 = tpu.matmul %138, %2, %cst_25 {dimension_numbers = #tpu.dot_dimension_numbers<[1], [0], [0], [1], [0, 0, 1, 1], [], []>} : vector<8x32xf32>, vector<32x128xf32>, vector<8x128xf32> -> vector<8x128xf32>
    %160 = arith.addf %158, %159 : vector<8x128xf32>
    %161 = arith.negf %160 : vector<8x128xf32>
    %162 = math.exp %161 : vector<8x128xf32>
    %cst_26 = arith.constant 1.000000e+00 : f32
    %163 = vector.broadcast %cst_26 : f32 to vector<8x128xf32>
    %164 = arith.addf %163, %162 : vector<8x128xf32>
    %165 = arith.divf %163, %164 : vector<8x128xf32>
    %166 = math.tanh %160 : vector<8x128xf32>
    %167 = vector.extract_strided_slice %165 {offsets = [0, 0], sizes = [8, 32], strides = [1, 1]} : vector<8x128xf32> to vector<8x32xf32>
    %168 = vector.extract_strided_slice %165 {offsets = [0, 32], sizes = [8, 32], strides = [1, 1]} : vector<8x128xf32> to vector<8x32xf32>
    %169 = vector.extract_strided_slice %166 {offsets = [0, 64], sizes = [8, 32], strides = [1, 1]} : vector<8x128xf32> to vector<8x32xf32>
    %170 = vector.extract_strided_slice %165 {offsets = [0, 96], sizes = [8, 32], strides = [1, 1]} : vector<8x128xf32> to vector<8x32xf32>
    %171 = arith.mulf %168, %136 : vector<8x32xf32>
    %172 = arith.mulf %167, %169 : vector<8x32xf32>
    %173 = arith.addf %171, %172 : vector<8x32xf32>
    %174 = math.tanh %173 : vector<8x32xf32>
    %175 = arith.mulf %170, %174 : vector<8x32xf32>
    %176 = tpu.concatenate %175, %157 in 1 : vector<8x32xf32>, vector<8x32xf32> -> vector<8x64xf32>
    %cst_27 = arith.constant dense<0.000000e+00> : vector<8x128xf32>
    %177 = tpu.matmul %176, %4, %cst_27 {dimension_numbers = #tpu.dot_dimension_numbers<[1], [0], [0], [1], [0, 0, 1, 1], [], []>} : vector<8x64xf32>, vector<64x128xf32>, vector<8x128xf32> -> vector<8x128xf32>
    %178 = vector.broadcast %5 : vector<1x128xf32> to vector<8x128xf32>
    %179 = arith.addf %177, %178 : vector<8x128xf32>
    %180 = arith.negf %179 : vector<8x128xf32>
    %181 = math.exp %180 : vector<8x128xf32>
    %cst_28 = arith.constant 1.000000e+00 : f32
    %182 = vector.broadcast %cst_28 : f32 to vector<8x128xf32>
    %183 = arith.addf %182, %181 : vector<8x128xf32>
    %184 = arith.divf %182, %183 : vector<8x128xf32>
    %185 = math.tanh %179 : vector<8x128xf32>
    %186 = vector.extract_strided_slice %184 {offsets = [0, 0], sizes = [8, 32], strides = [1, 1]} : vector<8x128xf32> to vector<8x32xf32>
    %187 = vector.extract_strided_slice %184 {offsets = [0, 32], sizes = [8, 32], strides = [1, 1]} : vector<8x128xf32> to vector<8x32xf32>
    %188 = vector.extract_strided_slice %185 {offsets = [0, 64], sizes = [8, 32], strides = [1, 1]} : vector<8x128xf32> to vector<8x32xf32>
    %189 = vector.extract_strided_slice %184 {offsets = [0, 96], sizes = [8, 32], strides = [1, 1]} : vector<8x128xf32> to vector<8x32xf32>
    %190 = arith.mulf %187, %155 : vector<8x32xf32>
    %191 = arith.mulf %186, %188 : vector<8x32xf32>
    %192 = arith.addf %190, %191 : vector<8x32xf32>
    %193 = math.tanh %192 : vector<8x32xf32>
    %194 = arith.mulf %189, %193 : vector<8x32xf32>
    %195 = vector.extract_strided_slice %9 {offsets = [40, 0], sizes = [8, 128], strides = [1, 1]} : vector<64x128xf32> to vector<8x128xf32>
    %cst_29 = arith.constant dense<0.000000e+00> : vector<8x128xf32>
    %196 = tpu.matmul %175, %2, %cst_29 {dimension_numbers = #tpu.dot_dimension_numbers<[1], [0], [0], [1], [0, 0, 1, 1], [], []>} : vector<8x32xf32>, vector<32x128xf32>, vector<8x128xf32> -> vector<8x128xf32>
    %197 = arith.addf %195, %196 : vector<8x128xf32>
    %198 = arith.negf %197 : vector<8x128xf32>
    %199 = math.exp %198 : vector<8x128xf32>
    %cst_30 = arith.constant 1.000000e+00 : f32
    %200 = vector.broadcast %cst_30 : f32 to vector<8x128xf32>
    %201 = arith.addf %200, %199 : vector<8x128xf32>
    %202 = arith.divf %200, %201 : vector<8x128xf32>
    %203 = math.tanh %197 : vector<8x128xf32>
    %204 = vector.extract_strided_slice %202 {offsets = [0, 0], sizes = [8, 32], strides = [1, 1]} : vector<8x128xf32> to vector<8x32xf32>
    %205 = vector.extract_strided_slice %202 {offsets = [0, 32], sizes = [8, 32], strides = [1, 1]} : vector<8x128xf32> to vector<8x32xf32>
    %206 = vector.extract_strided_slice %203 {offsets = [0, 64], sizes = [8, 32], strides = [1, 1]} : vector<8x128xf32> to vector<8x32xf32>
    %207 = vector.extract_strided_slice %202 {offsets = [0, 96], sizes = [8, 32], strides = [1, 1]} : vector<8x128xf32> to vector<8x32xf32>
    %208 = arith.mulf %205, %173 : vector<8x32xf32>
    %209 = arith.mulf %204, %206 : vector<8x32xf32>
    %210 = arith.addf %208, %209 : vector<8x32xf32>
    %211 = math.tanh %210 : vector<8x32xf32>
    %212 = arith.mulf %207, %211 : vector<8x32xf32>
    %213 = tpu.concatenate %212, %194 in 1 : vector<8x32xf32>, vector<8x32xf32> -> vector<8x64xf32>
    %cst_31 = arith.constant dense<0.000000e+00> : vector<8x128xf32>
    %214 = tpu.matmul %213, %4, %cst_31 {dimension_numbers = #tpu.dot_dimension_numbers<[1], [0], [0], [1], [0, 0, 1, 1], [], []>} : vector<8x64xf32>, vector<64x128xf32>, vector<8x128xf32> -> vector<8x128xf32>
    %215 = vector.broadcast %5 : vector<1x128xf32> to vector<8x128xf32>
    %216 = arith.addf %214, %215 : vector<8x128xf32>
    %217 = arith.negf %216 : vector<8x128xf32>
    %218 = math.exp %217 : vector<8x128xf32>
    %cst_32 = arith.constant 1.000000e+00 : f32
    %219 = vector.broadcast %cst_32 : f32 to vector<8x128xf32>
    %220 = arith.addf %219, %218 : vector<8x128xf32>
    %221 = arith.divf %219, %220 : vector<8x128xf32>
    %222 = math.tanh %216 : vector<8x128xf32>
    %223 = vector.extract_strided_slice %221 {offsets = [0, 0], sizes = [8, 32], strides = [1, 1]} : vector<8x128xf32> to vector<8x32xf32>
    %224 = vector.extract_strided_slice %221 {offsets = [0, 32], sizes = [8, 32], strides = [1, 1]} : vector<8x128xf32> to vector<8x32xf32>
    %225 = vector.extract_strided_slice %222 {offsets = [0, 64], sizes = [8, 32], strides = [1, 1]} : vector<8x128xf32> to vector<8x32xf32>
    %226 = vector.extract_strided_slice %221 {offsets = [0, 96], sizes = [8, 32], strides = [1, 1]} : vector<8x128xf32> to vector<8x32xf32>
    %227 = arith.mulf %224, %192 : vector<8x32xf32>
    %228 = arith.mulf %223, %225 : vector<8x32xf32>
    %229 = arith.addf %227, %228 : vector<8x32xf32>
    %230 = math.tanh %229 : vector<8x32xf32>
    %231 = arith.mulf %226, %230 : vector<8x32xf32>
    %232 = vector.extract_strided_slice %9 {offsets = [48, 0], sizes = [8, 128], strides = [1, 1]} : vector<64x128xf32> to vector<8x128xf32>
    %cst_33 = arith.constant dense<0.000000e+00> : vector<8x128xf32>
    %233 = tpu.matmul %212, %2, %cst_33 {dimension_numbers = #tpu.dot_dimension_numbers<[1], [0], [0], [1], [0, 0, 1, 1], [], []>} : vector<8x32xf32>, vector<32x128xf32>, vector<8x128xf32> -> vector<8x128xf32>
    %234 = arith.addf %232, %233 : vector<8x128xf32>
    %235 = arith.negf %234 : vector<8x128xf32>
    %236 = math.exp %235 : vector<8x128xf32>
    %cst_34 = arith.constant 1.000000e+00 : f32
    %237 = vector.broadcast %cst_34 : f32 to vector<8x128xf32>
    %238 = arith.addf %237, %236 : vector<8x128xf32>
    %239 = arith.divf %237, %238 : vector<8x128xf32>
    %240 = math.tanh %234 : vector<8x128xf32>
    %241 = vector.extract_strided_slice %239 {offsets = [0, 0], sizes = [8, 32], strides = [1, 1]} : vector<8x128xf32> to vector<8x32xf32>
    %242 = vector.extract_strided_slice %239 {offsets = [0, 32], sizes = [8, 32], strides = [1, 1]} : vector<8x128xf32> to vector<8x32xf32>
    %243 = vector.extract_strided_slice %240 {offsets = [0, 64], sizes = [8, 32], strides = [1, 1]} : vector<8x128xf32> to vector<8x32xf32>
    %244 = vector.extract_strided_slice %239 {offsets = [0, 96], sizes = [8, 32], strides = [1, 1]} : vector<8x128xf32> to vector<8x32xf32>
    %245 = arith.mulf %242, %210 : vector<8x32xf32>
    %246 = arith.mulf %241, %243 : vector<8x32xf32>
    %247 = arith.addf %245, %246 : vector<8x32xf32>
    %248 = math.tanh %247 : vector<8x32xf32>
    %249 = arith.mulf %244, %248 : vector<8x32xf32>
    %250 = tpu.concatenate %249, %231 in 1 : vector<8x32xf32>, vector<8x32xf32> -> vector<8x64xf32>
    %cst_35 = arith.constant dense<0.000000e+00> : vector<8x128xf32>
    %251 = tpu.matmul %250, %4, %cst_35 {dimension_numbers = #tpu.dot_dimension_numbers<[1], [0], [0], [1], [0, 0, 1, 1], [], []>} : vector<8x64xf32>, vector<64x128xf32>, vector<8x128xf32> -> vector<8x128xf32>
    %252 = vector.broadcast %5 : vector<1x128xf32> to vector<8x128xf32>
    %253 = arith.addf %251, %252 : vector<8x128xf32>
    %254 = arith.negf %253 : vector<8x128xf32>
    %255 = math.exp %254 : vector<8x128xf32>
    %cst_36 = arith.constant 1.000000e+00 : f32
    %256 = vector.broadcast %cst_36 : f32 to vector<8x128xf32>
    %257 = arith.addf %256, %255 : vector<8x128xf32>
    %258 = arith.divf %256, %257 : vector<8x128xf32>
    %259 = math.tanh %253 : vector<8x128xf32>
    %260 = vector.extract_strided_slice %258 {offsets = [0, 0], sizes = [8, 32], strides = [1, 1]} : vector<8x128xf32> to vector<8x32xf32>
    %261 = vector.extract_strided_slice %258 {offsets = [0, 32], sizes = [8, 32], strides = [1, 1]} : vector<8x128xf32> to vector<8x32xf32>
    %262 = vector.extract_strided_slice %259 {offsets = [0, 64], sizes = [8, 32], strides = [1, 1]} : vector<8x128xf32> to vector<8x32xf32>
    %263 = vector.extract_strided_slice %258 {offsets = [0, 96], sizes = [8, 32], strides = [1, 1]} : vector<8x128xf32> to vector<8x32xf32>
    %264 = arith.mulf %261, %229 : vector<8x32xf32>
    %265 = arith.mulf %260, %262 : vector<8x32xf32>
    %266 = arith.addf %264, %265 : vector<8x32xf32>
    %267 = math.tanh %266 : vector<8x32xf32>
    %268 = arith.mulf %263, %267 : vector<8x32xf32>
    %269 = vector.extract_strided_slice %9 {offsets = [56, 0], sizes = [8, 128], strides = [1, 1]} : vector<64x128xf32> to vector<8x128xf32>
    %cst_37 = arith.constant dense<0.000000e+00> : vector<8x128xf32>
    %270 = tpu.matmul %249, %2, %cst_37 {dimension_numbers = #tpu.dot_dimension_numbers<[1], [0], [0], [1], [0, 0, 1, 1], [], []>} : vector<8x32xf32>, vector<32x128xf32>, vector<8x128xf32> -> vector<8x128xf32>
    %271 = arith.addf %269, %270 : vector<8x128xf32>
    %272 = arith.negf %271 : vector<8x128xf32>
    %273 = math.exp %272 : vector<8x128xf32>
    %cst_38 = arith.constant 1.000000e+00 : f32
    %274 = vector.broadcast %cst_38 : f32 to vector<8x128xf32>
    %275 = arith.addf %274, %273 : vector<8x128xf32>
    %276 = arith.divf %274, %275 : vector<8x128xf32>
    %277 = math.tanh %271 : vector<8x128xf32>
    %278 = vector.extract_strided_slice %276 {offsets = [0, 0], sizes = [8, 32], strides = [1, 1]} : vector<8x128xf32> to vector<8x32xf32>
    %279 = vector.extract_strided_slice %276 {offsets = [0, 32], sizes = [8, 32], strides = [1, 1]} : vector<8x128xf32> to vector<8x32xf32>
    %280 = vector.extract_strided_slice %277 {offsets = [0, 64], sizes = [8, 32], strides = [1, 1]} : vector<8x128xf32> to vector<8x32xf32>
    %281 = vector.extract_strided_slice %276 {offsets = [0, 96], sizes = [8, 32], strides = [1, 1]} : vector<8x128xf32> to vector<8x32xf32>
    %282 = arith.mulf %279, %247 : vector<8x32xf32>
    %283 = arith.mulf %278, %280 : vector<8x32xf32>
    %284 = arith.addf %282, %283 : vector<8x32xf32>
    %285 = math.tanh %284 : vector<8x32xf32>
    %286 = arith.mulf %281, %285 : vector<8x32xf32>
    %287 = tpu.concatenate %286, %268 in 1 : vector<8x32xf32>, vector<8x32xf32> -> vector<8x64xf32>
    %cst_39 = arith.constant dense<0.000000e+00> : vector<8x128xf32>
    %288 = tpu.matmul %287, %4, %cst_39 {dimension_numbers = #tpu.dot_dimension_numbers<[1], [0], [0], [1], [0, 0, 1, 1], [], []>} : vector<8x64xf32>, vector<64x128xf32>, vector<8x128xf32> -> vector<8x128xf32>
    %289 = vector.broadcast %5 : vector<1x128xf32> to vector<8x128xf32>
    %290 = arith.addf %288, %289 : vector<8x128xf32>
    %291 = arith.negf %290 : vector<8x128xf32>
    %292 = math.exp %291 : vector<8x128xf32>
    %cst_40 = arith.constant 1.000000e+00 : f32
    %293 = vector.broadcast %cst_40 : f32 to vector<8x128xf32>
    %294 = arith.addf %293, %292 : vector<8x128xf32>
    %295 = arith.divf %293, %294 : vector<8x128xf32>
    %296 = math.tanh %290 : vector<8x128xf32>
    %297 = vector.extract_strided_slice %295 {offsets = [0, 0], sizes = [8, 32], strides = [1, 1]} : vector<8x128xf32> to vector<8x32xf32>
    %298 = vector.extract_strided_slice %295 {offsets = [0, 32], sizes = [8, 32], strides = [1, 1]} : vector<8x128xf32> to vector<8x32xf32>
    %299 = vector.extract_strided_slice %296 {offsets = [0, 64], sizes = [8, 32], strides = [1, 1]} : vector<8x128xf32> to vector<8x32xf32>
    %300 = vector.extract_strided_slice %295 {offsets = [0, 96], sizes = [8, 32], strides = [1, 1]} : vector<8x128xf32> to vector<8x32xf32>
    %301 = arith.mulf %298, %266 : vector<8x32xf32>
    %302 = arith.mulf %297, %299 : vector<8x32xf32>
    %303 = arith.addf %301, %302 : vector<8x32xf32>
    %304 = math.tanh %303 : vector<8x32xf32>
    %305 = arith.mulf %300, %304 : vector<8x32xf32>
    %c120 = arith.constant 120 : index
    %c0_41 = arith.constant 0 : index
    %306 = vector.load %arg2[%c120, %c0_41] : memref<128x128xf32, #tpu.memory_space<vmem>>, vector<1x32xf32>
    %c121 = arith.constant 121 : index
    %c0_42 = arith.constant 0 : index
    %307 = vector.load %arg2[%c121, %c0_42] : memref<128x128xf32, #tpu.memory_space<vmem>>, vector<1x1xf32>
    %308 = vector.broadcast %306 : vector<1x32xf32> to vector<8x32xf32>
    %309 = arith.mulf %305, %308 : vector<8x32xf32>
    %cst_43 = arith.constant dense<0.000000e+00> : vector<8xf32>
    %310 = vector.multi_reduction <add>, %309, %cst_43 [1] : vector<8x32xf32> to vector<8xf32>
    %311 = vector.shape_cast %310 : vector<8xf32> to vector<8x1xf32>
    %312 = vector.broadcast %307 : vector<1x1xf32> to vector<8x1xf32>
    %313 = arith.addf %311, %312 : vector<8x1xf32>
    %c0_44 = arith.constant 0 : index
    %c0_45 = arith.constant 0 : index
    %314 = vector.load %arg3[%c0_44, %c0_45] : memref<8x1xf32, #tpu.memory_space<vmem>>, vector<8x1xf32>
    tpu.vector_store %arg3[%c0_44, %c0_45], %313 {strides = array<i32>} : memref<8x1xf32, #tpu.memory_space<vmem>>, vector<8x1xf32>,
    return
  }
}

</mosaic_0001>

<bundles_post_ra>
// kernel: trajectory_evaluator_forward.1
= control target key start
LH: loop header
LB: loop body
LE: loop exit
PB: predicated region body
PF: predicated region fallthrough
CT: control target
= control target key end

     0   :  { %8 = vsyncpa [#allocation3], 0  ;;  %s1391_s15 = smov [#allocation2]   ;;  %s1392_s17 = smov 128   ;;  %s1749_s0 = inlined_call_operand.vmem [shape: f32[64,2], index: 0, kind: input, shape index: {}]   ;;  %s1750_s1 = inlined_call_operand.vmem [shape: f32[8,32], index: 1, kind: input, shape index: {}]   ;;  %s1751_s2 = inlined_call_operand.hbm [shape: f32[128,128], index: 2, kind: input, shape index: {}]   ;;  %s1752_s3 = inlined_call_operand.vmem [shape: f32[8,1], index: 3, kind: output, shape index: {}]  }
   0x1   :  { %s17_s14 = sshll.u32 %s1751_s2, 4  ;;  %s19_s16 = sshll.u32 %s1391_s15, 4  ;;  %s18_s14 = int_to_ptr.hbm [resolvable:$true] %s17_s14  ;;  %s20_s16 = int_to_ptr.vmem [resolvable:$true] %s19_s16 }
   0x2   :  { %s1393_s18 = smov 8  }
   0x3   :  { %25 = dma.hbm_to_vmem [thread:$0]  %s18_s14, 2048, %s20_s16, [#allocation3], %s1392_s17, %s1392_s17, %s1393_s18  }
   0x4   :  { %1389 = dma.done.wait [#allocation3], 2048  }
   0x5   :  { %1390 = vsyncadd [#allocation3], 4294965248  ;;  %vm80_vm0 = vcmask 1041408   ;;  %vm55_vm1 = vcmask 15360   ;;  %v1420_v0 = vld [vmem:[#allocation2 + $0x20] sm:$0xff]  ;;  %v1422_v1 = vld [vmem:[#allocation2 + $0x18] sm:$0xff] }
   0x6   :  { %v31_v2 = vld [vmem:[#allocation2] sm:$0x3]  ;;  %141 = vmatpush.msra.mxu1 %v1420_v0  ;;  %v1428_v4 = vld [vmem:[#allocation2 + $0x10] sm:$0xff]  ;;  %271 = vmatpush.msra.mxu3 %v1420_v0  ;;  %v1433_v5 = vld [vmem:[#allocation2 + $0x8] sm:$0xff]  ;;  %vm125_vm2 = vcmask 261120   ;;  %s1395_s22 = smov 32  }
   0x7   :  { %1184 = vmatpush.msk.msra.mxu0 %vm80_vm0, %v31_v2  ;;  %v46_v3 = vld [vmem:[%s1749_s0] sm:$0xff]  ;;  %v1448_v7 = vld [vmem:[#allocation2 + $0x28] ss:$0 sm:$0xff]  ;;  %v1467_v35 = vld [vmem:[#allocation2 + $0x58] sm:$0xff]  ;;  %vm196_vm7 = vcmask 523264  }
   0x8   :  { %1185 = vmatmul.msk.f32.vlgmr.msra.gmra.mxu0 %vm55_vm1, %v46_v3  ;;  %142 = vmatpush.msra.mxu1 %v1422_v1  ;;  %v30_v6 = vld [vmem:[%s1750_s1] sm:$0xff]  ;;  %s1394_s1 = smov 64   ;;  %v1461_v33 = vld [vmem:[#allocation2 + $0x68] sm:$0xff]  ;;  %v1472_v36 = vld [vmem:[#allocation2 + $0x50] sm:$0xff] }
   0x9   :  { %272 = vmatpush.msra.mxu3 %v1422_v1  ;;  %v1463_v34 = vld [vmem:[#allocation2 + $0x60] sm:$0xff]  ;;  %208 = vmatpush.msra.mxu2 %v1461_v33  ;;  %v1477_v37 = vld [vmem:[#allocation2 + $0x48] sm:$0xff]  ;;  %v1487_v39 = vld [vmem:[#allocation2 + $0x38] sm:$0xff] }
   0xa   :  { %143 = vmatpush.msra.mxu1 %v1428_v4  ;;  %1111 = vmatpush.msrb.mxu0 %v1461_v33  ;;  %v1482_v38 = vld [vmem:[#allocation2 + $0x40] sm:$0xff]  ;;  %v1497_v42 = vld [vmem:[#allocation2 + $0x30] sm:$0xff]  ;;  %v47_v43 = vld [vmem:[%s1749_s0 + $0x8] sm:$0xff] }
   0xb   :  { %273 = vmatpush.msra.mxu3 %v1428_v4  ;;  %209 = vmatpush.msra.mxu2 %v1463_v34  ;;  %v1539_v48 = vld [vmem:[#allocation2 + $0x70] ss:$0 sm:$0xff] }
   0xc   :  { %144 = vmatpush.msra.mxu1 %v1433_v5  ;;  %1112 = vmatpush.msrb.mxu0 %v1463_v34 }
   0xd   :  { %1193 = vmatmul.msk.f32.vlgmr.msra.gmra.mxu1 %vm125_vm2, %v30_v6  ;;  %274 = vmatpush.msra.mxu3 %v1433_v5 }
   0xe   :  { %337 = vmatpush.msrb.mxu1 %v1461_v33  ;;  %210 = vmatpush.msra.mxu2 %v1467_v35 }
   0xf   :  { %400 = vmatpush.msrb.mxu3 %v1420_v0  ;;  %1113 = vmatpush.msrb.mxu0 %v1467_v35 }
  0x10   :  { %338 = vmatpush.msrb.mxu1 %v1463_v34  ;;  %211 = vmatpush.msra.mxu2 %v1472_v36 }
  0x11   :  { %401 = vmatpush.msrb.mxu3 %v1422_v1  ;;  %1114 = vmatpush.msrb.mxu0 %v1472_v36 }
  0x12   :  { %339 = vmatpush.msrb.mxu1 %v1467_v35  ;;  %212 = vmatpush.msra.mxu2 %v1477_v37 }
  0x13   :  { %402 = vmatpush.msrb.mxu3 %v1428_v4  ;;  %1115 = vmatpush.msrb.mxu0 %v1477_v37 }
  0x14   :  { %340 = vmatpush.msrb.mxu1 %v1472_v36  ;;  %213 = vmatpush.msra.mxu2 %v1482_v38 }
  0x15   :  { %403 = vmatpush.msrb.mxu3 %v1433_v5  ;;  %1116 = vmatpush.msrb.mxu0 %v1482_v38 }
  0x16   :  { %341 = vmatpush.msrb.mxu1 %v1477_v37  ;;  %214 = vmatpush.msra.mxu2 %v1487_v39 }
  0x17   :  { %1117 = vmatpush.msrb.mxu0 %v1487_v39 }
  0x18   :  { %342 = vmatpush.msrb.mxu1 %v1482_v38  ;;  %215 = vmatpush.msra.mxu2 %v1497_v42 }
  0x19   :  { %1186 = vmatmul.msk.f32.gmra.mxu0 %vm55_vm1, %v47_v43 }
  0x1a   :  { %343 = vmatpush.msrb.mxu1 %v1487_v39  ;;  %466 = vmatpush.msrb.mxu2 %v1461_v33 }
  0x1b   :  { %1118 = vmatpush.msrb.mxu0 %v1497_v42 }
  0x1c   :  { %344 = vmatpush.msrb.mxu1 %v1497_v42  ;;  %467 = vmatpush.msrb.mxu2 %v1463_v34 }
  0x1e   :  { %595 = vmatpush.msra.mxu1 %v1461_v33  ;;  %468 = vmatpush.msrb.mxu2 %v1467_v35 }
  0x20   :  { %596 = vmatpush.msra.mxu1 %v1463_v34  ;;  %469 = vmatpush.msrb.mxu2 %v1472_v36 }
  0x22   :  { %597 = vmatpush.msra.mxu1 %v1467_v35  ;;  %470 = vmatpush.msrb.mxu2 %v1477_v37 }
  0x24   :  { %598 = vmatpush.msra.mxu1 %v1472_v36  ;;  %471 = vmatpush.msrb.mxu2 %v1482_v38 }
  0x26   :  { %599 = vmatpush.msra.mxu1 %v1477_v37  ;;  %472 = vmatpush.msrb.mxu2 %v1487_v39 }
  0x28   :  { %600 = vmatpush.msra.mxu1 %v1482_v38  ;;  %473 = vmatpush.msrb.mxu2 %v1497_v42 }
  0x2a   :  { %601 = vmatpush.msra.mxu1 %v1487_v39 }
  0x2c   :  { %602 = vmatpush.msra.mxu1 %v1497_v42 }
  0x85   :  { %v101_v8 = vpop.f32.mrf.mxu0 }
  0x86   :  { %v102_v9 = vadd.f32 %v1448_v7, %v101_v8 }
  0x8a   :  { %v146_v10 = vpop.f32.mrf.mxu1 }
  0x8b   :  { %v149_v11 = vadd.f32 %v146_v10, %v102_v9 }
  0x8d   :  { %1235 = vtanh.f32 %v149_v11  ;;  %v1194_v13 = vmul.f32 -1.442695, %v149_v11 }
  0x8f   :  { %1237 = vpow2.f32 %v1194_v13 }
  0x93   :  { %v1236_v12 = vpop.eup %1235 }
  0x94   :  { %175 = vrot.lane.b32.xlu0 %v1236_v12, %s1394_s1 }
  0x95   :  { %v1238_v14 = vpop.eup %1237 }
  0x96   :  { %v153_v15 = vadd.f32 1.0, %v1238_v14  ;;  %v104_v46 = vpop.f32.mrf.mxu0 }
  0x97   :  { %v105_v47 = vadd.f32 %v1448_v7, %v104_v46 }
  0x98   :  { %1239 = vrcp.f32 %v153_v15  ;;  %v165_v21 = vand.u32 2147483648, %v153_v15  ;;  %vm159_vm4 = vweird.f32 %v153_v15  ;;  %v163_v22 = vand.u32 2147483647, %v153_v15 }
  0x9a   :  { %v166_v24 = vor.u32 1.1754944e-38, %v165_v21  ;;  %vm164_vm6 = vcmp.eq.f32.partialorder %v163_v22, 8.507059e+37 }
  0x9c   :  { %170 = vrot.lane.b32.xlu0 %v30_v6, %s1395_s22 }
  0x9e   :  { %v1240_v16 = vpop.eup %1239 }
  0x9f   :  { %v155_v17 = vmul.f32 %v1240_v16, %v153_v15  ;;  %vm160_vm3 = vweird.f32 %v1240_v16 }
  0xa0   :  { %vm161_vm5 = vmor %vm159_vm4, %vm160_vm3 }
  0xa1   :  { %v156_v18 = vsub.f32 1.0, %v155_v17 }
  0xa3   :  { %v157_v19 = vmul.f32 %v1240_v16, %v156_v18 }
  0xa5   :  { %v158_v20 = vadd.f32 %v1240_v16, %v157_v19 }
  0xa7   :  { %v162_v23 = vsel %vm161_vm5, %v1240_v16, %v158_v20 }
  0xa8   :  { %v167_v26 = vsel %vm164_vm6, %v166_v24, %v162_v23 }
 0x106   :  { %v176_v25 = vpop.permute.xlu0 %175 }
 0x107   :  { %v178_v27 = vmul.f32 %v176_v25, %v167_v26 }
 0x109   :  { %180 = vrot.lane.b32.xlu1 %v178_v27, %s1395_s22 }
 0x10e   :  { %v1454_v28 = vpop.permute.xlu0 %170 }
 0x10f   :  { %v173_v29 = vmul.f32 %v1454_v28, %v167_v26 }
 0x17b   :  { %v181_v30 = vpop.permute.xlu1 %180 }
 0x17c   :  { %v1457_v31 = vadd.f32 %v181_v30, %v173_v29 }
 0x17e   :  { %1241 = vtanh.f32 %v1457_v31 }
 0x184   :  { %v1242_v32 = vpop.eup %1241 }
 0x185   :  { %186 = vrot.lane.b32.xlu1 %v1242_v32, %s1394_s1 }
 0x1f7   :  { %v187_v40 = vpop.permute.xlu1 %186 }
 0x1f8   :  { %v189_v41 = vmul.f32 %v187_v40, %v167_v26 }
 0x1fa   :  { %191 = vrot.lane.b32.xlu2 %v189_v41, %s1395_s22 }
 0x254   :  { %v192_v44 = vpop.permute.xlu2 %191 }
 0x255   :  { %1197 = vmatmul.msk.f32.vlgmr.msra.gmra.mxu3 %vm125_vm2, %v192_v44  ;;  %v194_v45 = vsel %vm125_vm2, %v192_v44, %v1454_v28 }
 0x256   :  { %1195 = vmatmul.msk.f32.vlgmr.msra.gmra.mxu2 %vm196_vm7, %v194_v45  ;;  %529 = vmatpush.msra.mxu3 %v1420_v0 }
 0x257   :  { %724 = vmatpush.msra.mxu2 %v1461_v33 }
 0x258   :  { %530 = vmatpush.msra.mxu3 %v1422_v1 }
 0x259   :  { %725 = vmatpush.msra.mxu2 %v1463_v34 }
 0x25a   :  { %531 = vmatpush.msra.mxu3 %v1428_v4 }
 0x25b   :  { %726 = vmatpush.msra.mxu2 %v1467_v35 }
 0x25c   :  { %532 = vmatpush.msra.mxu3 %v1433_v5 }
 0x25d   :  { %727 = vmatpush.msra.mxu2 %v1472_v36 }
 0x25f   :  { %728 = vmatpush.msra.mxu2 %v1477_v37 }
 0x261   :  { %729 = vmatpush.msra.mxu2 %v1482_v38 }
 0x263   :  { %730 = vmatpush.msra.mxu2 %v1487_v39 }
 0x265   :  { %731 = vmatpush.msra.mxu2 %v1497_v42 }
 0x2d8   :  { %v276_v49 = vpop.f32.mrf.mxu3 }
 0x2d9   :  { %v279_v50 = vadd.f32 %v276_v49, %v105_v47  ;;  %v217_v51 = vpop.f32.mrf.mxu2 }
 0x2da   :  { %v218_v52 = vadd.f32 %v1539_v48, %v217_v51 }
 0x2db   :  { %1243 = vtanh.f32 %v279_v50  ;;  %v1198_v55 = vmul.f32 -1.442695, %v279_v50 }
 0x2dc   :  { %1245 = vtanh.f32 %v218_v52  ;;  %v1196_v59 = vmul.f32 -1.442695, %v218_v52 }
 0x2dd   :  { %1247 = vpow2.f32 %v1198_v55 }
 0x2e1   :  { %v1244_v53 = vpop.eup %1243 }
 0x2e2   :  { %v1246_v54 = vpop.eup %1245  ;;  %302 = vrot.lane.b32.xlu2 %v1244_v53, %s1394_s1 }
 0x2e3   :  { %242 = vrot.lane.b32.xlu0 %v1246_v54, %s1394_s1  ;;  %v1248_v56 = vpop.eup %1247 }
 0x2e4   :  { %v283_v57 = vadd.f32 1.0, %v1248_v56 }
 0x2e6   :  { %1249 = vrcp.f32 %v283_v57  ;;  %v295_v6 = vand.u32 2147483648, %v283_v57  ;;  %vm289_vm9 = vweird.f32 %v283_v57  ;;  %v293_v8 = vand.u32 2147483647, %v283_v57 }
 0x2e7   :  { %1251 = vpow2.f32 %v1196_v59 }
 0x2e8   :  { %v296_v10 = vor.u32 1.1754944e-38, %v295_v6  ;;  %vm294_vm11 = vcmp.eq.f32.partialorder %v293_v8, 8.507059e+37 }
 0x2ec   :  { %v1250_v58 = vpop.eup %1249 }
 0x2ed   :  { %v285_v60 = vmul.f32 %v1250_v58, %v283_v57  ;;  %v1252_v63 = vpop.eup %1251  ;;  %vm290_vm8 = vweird.f32 %v1250_v58 }
 0x2ee   :  { %v223_v2 = vadd.f32 1.0, %v1252_v63  ;;  %vm291_vm10 = vmor %vm289_vm9, %vm290_vm8 }
 0x2ef   :  { %v286_v61 = vsub.f32 1.0, %v285_v60 }
 0x2f0   :  { %1253 = vrcp.f32 %v223_v2  ;;  %v235_v19 = vand.u32 2147483648, %v223_v2  ;;  %vm229_vm13 = vweird.f32 %v223_v2  ;;  %v233_v20 = vand.u32 2147483647, %v223_v2 }
 0x2f1   :  { %v287_v62 = vmul.f32 %v1250_v58, %v286_v61 }
 0x2f2   :  { %v236_v22 = vor.u32 1.1754944e-38, %v235_v19  ;;  %vm234_vm15 = vcmp.eq.f32.partialorder %v233_v20, 8.507059e+37 }
 0x2f3   :  { %v288_v3 = vadd.f32 %v1250_v58, %v287_v62 }
 0x2f5   :  { %v292_v9 = vsel %vm291_vm10, %v1250_v58, %v288_v3 }
 0x2f6   :  { %v297_v12 = vsel %vm294_vm11, %v296_v10, %v292_v9  ;;  %v1254_v14 = vpop.eup %1253 }
 0x2f7   :  { %v225_v15 = vmul.f32 %v1254_v14, %v223_v2  ;;  %vm230_vm12 = vweird.f32 %v1254_v14  ;;  %v300_v26 = vmul.f32 %v297_v12, %v1457_v31 }
 0x2f8   :  { %vm231_vm14 = vmor %vm229_vm13, %vm230_vm12 }
 0x2f9   :  { %v226_v16 = vsub.f32 1.0, %v225_v15 }
 0x2fb   :  { %v227_v17 = vmul.f32 %v1254_v14, %v226_v16 }
 0x2fd   :  { %v228_v18 = vadd.f32 %v1254_v14, %v227_v17 }
 0x2ff   :  { %v232_v21 = vsel %vm231_vm14, %v1254_v14, %v228_v18 }
 0x300   :  { %v237_v24 = vsel %vm234_vm15, %v236_v22, %v232_v21 }
 0x301   :  { %v240_v29 = vmul.f32 %v237_v24, %v1454_v28  ;;  %v48_v28 = vld [vmem:[%s1749_s0 + $0x10] sm:$0xff] }
 0x302   :  { %1187 = vmatmul.msk.f32.gmra.mxu0 %vm55_vm1, %v48_v28 }
 0x33c   :  { %v303_v11 = vpop.permute.xlu2 %302 }
 0x33d   :  { %v305_v13 = vmul.f32 %v303_v11, %v297_v12 }
 0x33f   :  { %307 = vrot.lane.b32.xlu1 %v305_v13, %s1395_s22 }
 0x355   :  { %v243_v23 = vpop.permute.xlu0 %242 }
 0x356   :  { %v245_v25 = vmul.f32 %v243_v23, %v237_v24 }
 0x358   :  { %247 = vrot.lane.b32.xlu2 %v245_v25, %s1395_s22 }
 0x37f   :  { %v107_v51 = vpop.f32.mrf.mxu0 }
 0x380   :  { %v108_v52 = vadd.f32 %v1448_v7, %v107_v51 }
 0x3b1   :  { %v308_v27 = vpop.permute.xlu1 %307 }
 0x3b2   :  { %v1548_v30 = vadd.f32 %v308_v27, %v300_v26  ;;  %v248_v32 = vpop.permute.xlu2 %247 }
 0x3b3   :  { %v1550_v40 = vadd.f32 %v248_v32, %v240_v29 }
 0x3b4   :  { %1255 = vtanh.f32 %v1548_v30 }
 0x3b5   :  { %1257 = vtanh.f32 %v1550_v40 }
 0x3ba   :  { %v1256_v41 = vpop.eup %1255 }
 0x3bb   :  { %v1258_v43 = vpop.eup %1257  ;;  %313 = vrot.lane.b32.xlu0 %v1256_v41, %s1394_s1 }
 0x3bc   :  { %253 = vrot.lane.b32.xlu1 %v1258_v43, %s1394_s1 }
 0x42d   :  { %v314_v44 = vpop.permute.xlu0 %313 }
 0x42e   :  { %v316_v31 = vmul.f32 %v314_v44, %v297_v12  ;;  %v254_v45 = vpop.permute.xlu1 %253 }
 0x42f   :  { %v256_v46 = vmul.f32 %v254_v45, %v237_v24 }
 0x430   :  { %318 = vrot.lane.b32.xlu2 %v316_v31, %s1395_s22 }
 0x431   :  { %322 = vrot.lane.b32.xlu0 %v256_v46, %s1394_s1 }
 0x48a   :  { %v319_v47 = vpop.permute.xlu2 %318 }
 0x48b   :  { %1201 = vmatmul.msk.f32.vlgmr.msrb.gmra.mxu3 %vm125_vm2, %v319_v47 }
 0x48c   :  { %658 = vmatpush.msrb.mxu3 %v1420_v0 }
 0x48e   :  { %659 = vmatpush.msrb.mxu3 %v1422_v1 }
 0x490   :  { %660 = vmatpush.msrb.mxu3 %v1428_v4 }
 0x492   :  { %661 = vmatpush.msrb.mxu3 %v1433_v5 }
 0x4a3   :  { %v323_v49 = vpop.permute.xlu0 %322 }
 0x4a4   :  { %v325_v50 = vsel %vm125_vm2, %v319_v47, %v323_v49 }
 0x4a5   :  { %1199 = vmatmul.msk.f32.vlgmr.msrb.gmra.mxu1 %vm196_vm7, %v325_v50 }
 0x4a6   :  { %853 = vmatpush.msrb.mxu1 %v1461_v33 }
 0x4a8   :  { %854 = vmatpush.msrb.mxu1 %v1463_v34 }
 0x4aa   :  { %855 = vmatpush.msrb.mxu1 %v1467_v35 }
 0x4ac   :  { %856 = vmatpush.msrb.mxu1 %v1472_v36 }
 0x4ae   :  { %857 = vmatpush.msrb.mxu1 %v1477_v37 }
 0x4b0   :  { %858 = vmatpush.msrb.mxu1 %v1482_v38 }
 0x4b2   :  { %859 = vmatpush.msrb.mxu1 %v1487_v39 }
 0x4b4   :  { %860 = vmatpush.msrb.mxu1 %v1497_v42 }
 0x50e   :  { %v405_v53 = vpop.f32.mrf.mxu3 }
 0x50f   :  { %v408_v54 = vadd.f32 %v405_v53, %v108_v52 }
 0x511   :  { %1259 = vtanh.f32 %v408_v54  ;;  %v1202_v60 = vmul.f32 -1.442695, %v408_v54 }
 0x517   :  { %v1260_v55 = vpop.eup %1259 }
 0x518   :  { %431 = vrot.lane.b32.xlu1 %v1260_v55, %s1394_s1 }
 0x522   :  { %v346_v56 = vpop.f32.mrf.mxu1 }
 0x523   :  { %v347_v57 = vadd.f32 %v1539_v48, %v346_v56 }
 0x525   :  { %1261 = vtanh.f32 %v347_v57  ;;  %v1200_v59 = vmul.f32 -1.442695, %v347_v57 }
 0x527   :  { %1263 = vpow2.f32 %v1200_v59 }
 0x528   :  { %1265 = vpow2.f32 %v1202_v60 }
 0x52b   :  { %v1262_v58 = vpop.eup %1261 }
 0x52c   :  { %371 = vrot.lane.b32.xlu2 %v1262_v58, %s1394_s1 }
 0x52d   :  { %v1264_v61 = vpop.eup %1263 }
 0x52e   :  { %v352_v62 = vadd.f32 1.0, %v1264_v61  ;;  %v1266_v63 = vpop.eup %1265 }
 0x52f   :  { %v412_v2 = vadd.f32 1.0, %v1266_v63 }
 0x530   :  { %1267 = vrcp.f32 %v352_v62  ;;  %v364_v15 = vand.u32 2147483648, %v352_v62  ;;  %vm358_vm3 = vweird.f32 %v352_v62  ;;  %v362_v16 = vand.u32 2147483647, %v352_v62 }
 0x531   :  { %1269 = vrcp.f32 %v412_v2  ;;  %v424_v20 = vand.u32 2147483648, %v412_v2  ;;  %vm418_vm8 = vweird.f32 %v412_v2  ;;  %v422_v21 = vand.u32 2147483647, %v412_v2 }
 0x532   :  { %v365_v19 = vor.u32 1.1754944e-38, %v364_v15  ;;  %vm363_vm6 = vcmp.eq.f32.partialorder %v362_v16, 8.507059e+37 }
 0x533   :  { %v425_v26 = vor.u32 1.1754944e-38, %v424_v20  ;;  %vm423_vm10 = vcmp.eq.f32.partialorder %v422_v21, 8.507059e+37 }
 0x536   :  { %v1268_v3 = vpop.eup %1267 }
 0x537   :  { %v354_v6 = vmul.f32 %v1268_v3, %v352_v62  ;;  %v1270_v8 = vpop.eup %1269  ;;  %vm359_vm0 = vweird.f32 %v1268_v3 }
 0x538   :  { %v414_v10 = vmul.f32 %v1270_v8, %v412_v2  ;;  %vm360_vm4 = vmor %vm358_vm3, %vm359_vm0  ;;  %vm419_vm5 = vweird.f32 %v1270_v8 }
 0x539   :  { %v355_v9 = vsub.f32 1.0, %v354_v6  ;;  %vm420_vm9 = vmor %vm418_vm8, %vm419_vm5 }
 0x53a   :  { %v415_v12 = vsub.f32 1.0, %v414_v10 }
 0x53b   :  { %v356_v11 = vmul.f32 %v1268_v3, %v355_v9 }
 0x53c   :  { %v416_v14 = vmul.f32 %v1270_v8, %v415_v12 }
 0x53d   :  { %v357_v13 = vadd.f32 %v1268_v3, %v356_v11 }
 0x53e   :  { %v417_v18 = vadd.f32 %v1270_v8, %v416_v14 }
 0x53f   :  { %v361_v17 = vsel %vm360_vm4, %v1268_v3, %v357_v13 }
 0x540   :  { %v366_v23 = vsel %vm363_vm6, %v365_v19, %v361_v17  ;;  %v421_v25 = vsel %vm420_vm9, %v1270_v8, %v417_v18 }
 0x541   :  { %v426_v27 = vsel %vm423_vm10, %v425_v26, %v421_v25  ;;  %v369_v41 = vmul.f32 %v366_v23, %v1550_v40 }
 0x542   :  { %v429_v31 = vmul.f32 %v426_v27, %v1548_v30  ;;  %v49_v30 = vld [vmem:[%s1749_s0 + $0x18] sm:$0xff] }
 0x543   :  { %1188 = vmatmul.msk.f32.gmra.mxu0 %vm55_vm1, %v49_v30 }
 0x586   :  { %v372_v22 = vpop.permute.xlu2 %371 }
 0x587   :  { %v374_v24 = vmul.f32 %v372_v22, %v366_v23 }
 0x589   :  { %376 = vrot.lane.b32.xlu1 %v374_v24, %s1395_s22 }
 0x58a   :  { %v432_v29 = vpop.permute.xlu1 %431 }
 0x58b   :  { %v434_v32 = vmul.f32 %v432_v29, %v426_v27 }
 0x58d   :  { %436 = vrot.lane.b32.xlu0 %v434_v32, %s1395_s22 }
 0x5fb   :  { %v377_v43 = vpop.permute.xlu1 %376 }
 0x5fc   :  { %v1584_v44 = vadd.f32 %v377_v43, %v369_v41 }
 0x5fe   :  { %1271 = vtanh.f32 %v1584_v44 }
 0x5ff   :  { %v437_v45 = vpop.permute.xlu0 %436 }
 0x600   :  { %v1588_v46 = vadd.f32 %v437_v45, %v429_v31 }
 0x602   :  { %1273 = vtanh.f32 %v1588_v46 }
 0x604   :  { %v1272_v28 = vpop.eup %1271 }
 0x605   :  { %382 = vrot.lane.b32.xlu0 %v1272_v28, %s1394_s1 }
 0x608   :  { %v1274_v47 = vpop.eup %1273 }
 0x609   :  { %442 = vrot.lane.b32.xlu2 %v1274_v47, %s1394_s1 }
 0x663   :  { %v443_v49 = vpop.permute.xlu2 %442 }
 0x664   :  { %v445_v40 = vmul.f32 %v443_v49, %v426_v27 }
 0x666   :  { %447 = vrot.lane.b32.xlu1 %v445_v40, %s1395_s22 }
 0x677   :  { %v383_v50 = vpop.permute.xlu0 %382 }
 0x678   :  { %v385_v51 = vmul.f32 %v383_v50, %v366_v23 }
 0x67a   :  { %451 = vrot.lane.b32.xlu2 %v385_v51, %s1394_s1 }
 0x6d4   :  { %v452_v52 = vpop.permute.xlu2 %451 }
 0x6d8   :  { %v448_v53 = vpop.permute.xlu1 %447 }
 0x6d9   :  { %v454_v54 = vsel %vm125_vm2, %v448_v53, %v452_v52  ;;  %1205 = vmatmul.msk.f32.vlgmr.msra.gmra.mxu3 %vm125_vm2, %v448_v53 }
 0x6da   :  { %1203 = vmatmul.msk.f32.vlgmr.msrb.gmra.mxu2 %vm196_vm7, %v454_v54  ;;  %787 = vmatpush.msra.mxu3 %v1420_v0 }
 0x6db   :  { %982 = vmatpush.msrb.mxu2 %v1461_v33  ;;  %v110_v33 = vpop.f32.mrf.mxu0 }
 0x6dc   :  { %788 = vmatpush.msra.mxu3 %v1422_v1  ;;  %v111_v55 = vadd.f32 %v1448_v7, %v110_v33 }
 0x6dd   :  { %983 = vmatpush.msrb.mxu2 %v1463_v34 }
 0x6de   :  { %789 = vmatpush.msra.mxu3 %v1428_v4 }
 0x6df   :  { %984 = vmatpush.msrb.mxu2 %v1467_v35 }
 0x6e0   :  { %790 = vmatpush.msra.mxu3 %v1433_v5 }
 0x6e1   :  { %985 = vmatpush.msrb.mxu2 %v1472_v36 }
 0x6e3   :  { %986 = vmatpush.msrb.mxu2 %v1477_v37 }
 0x6e5   :  { %987 = vmatpush.msrb.mxu2 %v1482_v38 }
 0x6e7   :  { %988 = vmatpush.msrb.mxu2 %v1487_v39 }
 0x6e9   :  { %989 = vmatpush.msrb.mxu2 %v1497_v42 }
 0x75c   :  { %v534_v34 = vpop.f32.mrf.mxu3 }
 0x75d   :  { %v537_v56 = vadd.f32 %v534_v34, %v111_v55  ;;  %v475_v57 = vpop.f32.mrf.mxu2 }
 0x75e   :  { %v476_v35 = vadd.f32 %v1539_v48, %v475_v57 }
 0x75f   :  { %1275 = vtanh.f32 %v537_v56  ;;  %v1206_v37 = vmul.f32 -1.442695, %v537_v56 }
 0x760   :  { %1277 = vtanh.f32 %v476_v35  ;;  %v1204_v38 = vmul.f32 -1.442695, %v476_v35 }
 0x761   :  { %1279 = vpow2.f32 %v1206_v37 }
 0x762   :  { %1281 = vpow2.f32 %v1204_v38 }
 0x765   :  { %v1276_v58 = vpop.eup %1275 }
 0x766   :  { %v1278_v36 = vpop.eup %1277  ;;  %560 = vrot.lane.b32.xlu0 %v1276_v58, %s1394_s1 }
 0x767   :  { %500 = vrot.lane.b32.xlu1 %v1278_v36, %s1394_s1  ;;  %v1280_v39 = vpop.eup %1279 }
 0x768   :  { %v1282_v42 = vpop.eup %1281  ;;  %v541_v59 = vadd.f32 1.0, %v1280_v39 }
 0x769   :  { %v481_v60 = vadd.f32 1.0, %v1282_v42 }
 0x76a   :  { %1283 = vrcp.f32 %v541_v59  ;;  %v553_v11 = vand.u32 2147483648, %v541_v59  ;;  %vm547_vm13 = vweird.f32 %v541_v59  ;;  %v551_v13 = vand.u32 2147483647, %v541_v59 }
 0x76b   :  { %1285 = vrcp.f32 %v481_v60  ;;  %v493_v14 = vand.u32 2147483648, %v481_v60  ;;  %vm487_vm15 = vweird.f32 %v481_v60  ;;  %v491_v15 = vand.u32 2147483647, %v481_v60 }
 0x76c   :  { %v554_v17 = vor.u32 1.1754944e-38, %v553_v11  ;;  %vm552_vm3 = vcmp.eq.f32.partialorder %v551_v13, 8.507059e+37 }
 0x76d   :  { %v494_v19 = vor.u32 1.1754944e-38, %v493_v14  ;;  %vm492_vm4 = vcmp.eq.f32.partialorder %v491_v15, 8.507059e+37 }
 0x770   :  { %v1284_v61 = vpop.eup %1283 }
 0x771   :  { %v1286_v62 = vpop.eup %1285  ;;  %v543_v63 = vmul.f32 %v1284_v61, %v541_v59  ;;  %vm548_vm11 = vweird.f32 %v1284_v61 }
 0x772   :  { %v483_v2 = vmul.f32 %v1286_v62, %v481_v60  ;;  %vm488_vm12 = vweird.f32 %v1286_v62  ;;  %vm549_vm14 = vmor %vm547_vm13, %vm548_vm11 }
 0x773   :  { %v544_v3 = vsub.f32 1.0, %v543_v63  ;;  %vm489_vm0 = vmor %vm487_vm15, %vm488_vm12 }
 0x774   :  { %v484_v6 = vsub.f32 1.0, %v483_v2 }
 0x775   :  { %v545_v8 = vmul.f32 %v1284_v61, %v544_v3 }
 0x776   :  { %v485_v9 = vmul.f32 %v1286_v62, %v484_v6 }
 0x777   :  { %v546_v10 = vadd.f32 %v1284_v61, %v545_v8 }
 0x778   :  { %v486_v12 = vadd.f32 %v1286_v62, %v485_v9 }
 0x779   :  { %v550_v16 = vsel %vm549_vm14, %v1284_v61, %v546_v10 }
 0x77a   :  { %v490_v18 = vsel %vm489_vm0, %v1286_v62, %v486_v12  ;;  %v555_v21 = vsel %vm552_vm3, %v554_v17, %v550_v16 }
 0x77b   :  { %v495_v24 = vsel %vm492_vm4, %v494_v19, %v490_v18  ;;  %v558_v26 = vmul.f32 %v555_v21, %v1588_v46 }
 0x77c   :  { %v498_v41 = vmul.f32 %v495_v24, %v1584_v44  ;;  %v50_v44 = vld [vmem:[%s1749_s0 + $0x20] sm:$0xff] }
 0x77d   :  { %1189 = vmatmul.msk.f32.gmra.mxu0 %vm55_vm1, %v50_v44 }
 0x7d8   :  { %v561_v20 = vpop.permute.xlu0 %560 }
 0x7d9   :  { %v563_v22 = vmul.f32 %v561_v20, %v555_v21  ;;  %v501_v23 = vpop.permute.xlu1 %500 }
 0x7da   :  { %v503_v25 = vmul.f32 %v501_v23, %v495_v24 }
 0x7db   :  { %565 = vrot.lane.b32.xlu2 %v563_v22, %s1395_s22 }
 0x7dc   :  { %505 = vrot.lane.b32.xlu0 %v503_v25, %s1395_s22 }
 0x7fa   :  { %v113_v30 = vpop.f32.mrf.mxu0 }
 0x7fb   :  { %v114_v54 = vadd.f32 %v1448_v7, %v113_v30 }
 0x835   :  { %v566_v27 = vpop.permute.xlu2 %565 }
 0x836   :  { %v1621_v29 = vadd.f32 %v566_v27, %v558_v26 }
 0x838   :  { %1287 = vtanh.f32 %v1621_v29 }
 0x83e   :  { %v1288_v32 = vpop.eup %1287 }
 0x83f   :  { %571 = vrot.lane.b32.xlu1 %v1288_v32, %s1394_s1 }
 0x84e   :  { %v506_v43 = vpop.permute.xlu0 %505 }
 0x84f   :  { %v1626_v31 = vadd.f32 %v506_v43, %v498_v41 }
 0x851   :  { %1289 = vtanh.f32 %v1626_v31 }
 0x857   :  { %v1290_v45 = vpop.eup %1289 }
 0x858   :  { %511 = vrot.lane.b32.xlu2 %v1290_v45, %s1394_s1 }
 0x8b1   :  { %v572_v28 = vpop.permute.xlu1 %571 }
 0x8b2   :  { %v574_v46 = vmul.f32 %v572_v28, %v555_v21  ;;  %v512_v47 = vpop.permute.xlu2 %511 }
 0x8b3   :  { %v514_v49 = vmul.f32 %v512_v47, %v495_v24 }
 0x8b4   :  { %576 = vrot.lane.b32.xlu0 %v574_v46, %s1395_s22 }
 0x8b5   :  { %580 = vrot.lane.b32.xlu1 %v514_v49, %s1394_s1 }
 0x926   :  { %v577_v40 = vpop.permute.xlu0 %576 }
 0x927   :  { %1209 = vmatmul.msk.f32.vlgmr.msrb.gmra.mxu3 %vm125_vm2, %v577_v40  ;;  %v581_v50 = vpop.permute.xlu1 %580 }
 0x928   :  { %v583_v51 = vsel %vm125_vm2, %v577_v40, %v581_v50  ;;  %916 = vmatpush.msrb.mxu3 %v1420_v0 }
 0x929   :  { %1207 = vmatmul.msk.f32.vlgmr.msra.gmra.mxu1 %vm196_vm7, %v583_v51 }
 0x92a   :  { %917 = vmatpush.msrb.mxu3 %v1422_v1 }
 0x92c   :  { %918 = vmatpush.msrb.mxu3 %v1428_v4 }
 0x92e   :  { %919 = vmatpush.msrb.mxu3 %v1433_v5 }
 0x9a6   :  { %v604_v52 = vpop.f32.mrf.mxu1 }
 0x9a7   :  { %v605_v53 = vadd.f32 %v1539_v48, %v604_v52 }
 0x9a9   :  { %1291 = vtanh.f32 %v605_v53  ;;  %v1208_v36 = vmul.f32 -1.442695, %v605_v53 }
 0x9aa   :  { %v663_v33 = vpop.f32.mrf.mxu3 }
 0x9ab   :  { %v666_v55 = vadd.f32 %v663_v33, %v114_v54 }
 0x9ad   :  { %1293 = vtanh.f32 %v666_v55  ;;  %v1210_v57 = vmul.f32 -1.442695, %v666_v55 }
 0x9af   :  { %v1292_v34 = vpop.eup %1291  ;;  %1295 = vpow2.f32 %v1210_v57 }
 0x9b0   :  { %629 = vrot.lane.b32.xlu0 %v1292_v34, %s1394_s1 }
 0x9b3   :  { %v1294_v56 = vpop.eup %1293 }
 0x9b4   :  { %689 = vrot.lane.b32.xlu2 %v1294_v56, %s1394_s1 }
 0x9b5   :  { %v1296_v35 = vpop.eup %1295 }
 0x9b6   :  { %v670_v58 = vadd.f32 1.0, %v1296_v35 }
 0x9b8   :  { %1297 = vrcp.f32 %v670_v58  ;;  %v682_v62 = vand.u32 2147483648, %v670_v58  ;;  %vm676_vm6 = vweird.f32 %v670_v58  ;;  %v680_v63 = vand.u32 2147483647, %v670_v58 }
 0x9b9   :  { %1299 = vpow2.f32 %v1208_v36 }
 0x9ba   :  { %v683_v6 = vor.u32 1.1754944e-38, %v682_v62  ;;  %vm681_vm9 = vcmp.eq.f32.partialorder %v680_v63, 8.507059e+37 }
 0x9be   :  { %v1298_v37 = vpop.eup %1297 }
 0x9bf   :  { %v672_v38 = vmul.f32 %v1298_v37, %v670_v58  ;;  %v1300_v39 = vpop.eup %1299  ;;  %vm677_vm5 = vweird.f32 %v1298_v37 }
 0x9c0   :  { %v610_v59 = vadd.f32 1.0, %v1300_v39  ;;  %vm678_vm8 = vmor %vm676_vm6, %vm677_vm5 }
 0x9c1   :  { %v673_v42 = vsub.f32 1.0, %v672_v38 }
 0x9c2   :  { %1301 = vrcp.f32 %v610_v59  ;;  %v622_v15 = vand.u32 2147483648, %v610_v59  ;;  %vm616_vm11 = vweird.f32 %v610_v59  ;;  %v620_v16 = vand.u32 2147483647, %v610_v59 }
 0x9c3   :  { %v674_v60 = vmul.f32 %v1298_v37, %v673_v42 }
 0x9c4   :  { %v623_v18 = vor.u32 1.1754944e-38, %v622_v15  ;;  %vm621_vm13 = vcmp.eq.f32.partialorder %v620_v16, 8.507059e+37 }
 0x9c5   :  { %v675_v61 = vadd.f32 %v1298_v37, %v674_v60 }
 0x9c7   :  { %v679_v2 = vsel %vm678_vm8, %v1298_v37, %v675_v61 }
 0x9c8   :  { %v1302_v3 = vpop.eup %1301  ;;  %v684_v8 = vsel %vm681_vm9, %v683_v6, %v679_v2 }
 0x9c9   :  { %v612_v11 = vmul.f32 %v1302_v3, %v610_v59  ;;  %vm617_vm10 = vweird.f32 %v1302_v3  ;;  %v687_v25 = vmul.f32 %v684_v8, %v1621_v29  ;;  %v51_v29 = vld [vmem:[%s1749_s0 + $0x28] sm:$0xff] }
 0x9ca   :  { %vm618_vm12 = vmor %vm616_vm11, %vm617_vm10  ;;  %1190 = vmatmul.msk.f32.gmra.mxu0 %vm55_vm1, %v51_v29 }
 0x9cb   :  { %v613_v12 = vsub.f32 1.0, %v612_v11 }
 0x9cd   :  { %v614_v13 = vmul.f32 %v1302_v3, %v613_v12 }
 0x9cf   :  { %v615_v14 = vadd.f32 %v1302_v3, %v614_v13 }
 0x9d1   :  { %v619_v17 = vsel %vm618_vm12, %v1302_v3, %v615_v14 }
 0x9d2   :  { %v624_v20 = vsel %vm621_vm13, %v623_v18, %v619_v17 }
 0x9d3   :  { %v627_v22 = vmul.f32 %v624_v20, %v1626_v31 }
 0xa0e   :  { %v690_v9 = vpop.permute.xlu2 %689 }
 0xa0f   :  { %v692_v10 = vmul.f32 %v690_v9, %v684_v8 }
 0xa11   :  { %694 = vrot.lane.b32.xlu1 %v692_v10, %s1395_s22 }
 0xa22   :  { %v630_v19 = vpop.permute.xlu0 %629 }
 0xa23   :  { %v632_v21 = vmul.f32 %v630_v19, %v624_v20 }
 0xa25   :  { %634 = vrot.lane.b32.xlu2 %v632_v21, %s1395_s22 }
 0xa47   :  { %v116_v44 = vpop.f32.mrf.mxu0 }
 0xa48   :  { %v117_v40 = vadd.f32 %v1448_v7, %v116_v44 }
 0xa7f   :  { %v635_v23 = vpop.permute.xlu2 %634 }
 0xa80   :  { %v1650_v24 = vadd.f32 %v635_v23, %v627_v22 }
 0xa82   :  { %1303 = vtanh.f32 %v1650_v24 }
 0xa83   :  { %v695_v26 = vpop.permute.xlu1 %694 }
 0xa84   :  { %v1654_v27 = vadd.f32 %v695_v26, %v687_v25  ;;  %v52_v25 = vld [vmem:[%s1749_s0 + $0x30] sm:$0xff] }
 0xa85   :  { %1191 = vmatmul.msk.f32.gmra.mxu0 %vm55_vm1, %v52_v25  ;;  %v1725_v25 = vld [vmem:[#allocation2 + $0x70] ss:$0 sm:$0xff] }
 0xa86   :  { %1305 = vtanh.f32 %v1654_v27 }
 0xa88   :  { %v1304_v32 = vpop.eup %1303 }
 0xa89   :  { %640 = vrot.lane.b32.xlu1 %v1304_v32, %s1394_s1 }
 0xa8c   :  { %v1306_v41 = vpop.eup %1305 }
 0xa8d   :  { %700 = vrot.lane.b32.xlu0 %v1306_v41, %s1394_s1 }
 0xafb   :  { %v641_v43 = vpop.permute.xlu1 %640 }
 0xafc   :  { %v643_v31 = vmul.f32 %v641_v43, %v624_v20 }
 0xafe   :  { %709 = vrot.lane.b32.xlu0 %v643_v31, %s1394_s1 }
 0xaff   :  { %v701_v45 = vpop.permute.xlu0 %700 }
 0xb00   :  { %v703_v28 = vmul.f32 %v701_v45, %v684_v8  ;;  %v1698_v45 = vld [vmem:[#allocation2 + $0x28] ss:$0 sm:$0xff] }
 0xb02   :  { %705 = vrot.lane.b32.xlu2 %v703_v28, %s1395_s22  ;;  %v119_v41 = vpop.f32.mrf.mxu0 }
 0xb03   :  { %v120_v28 = vadd.f32 %v1698_v45, %v119_v41 }
 0xb5c   :  { %v706_v46 = vpop.permute.xlu2 %705 }
 0xb5d   :  { %1213 = vmatmul.msk.f32.vlgmr.msra.gmra.mxu3 %vm125_vm2, %v706_v46 }
 0xb5e   :  { %1045 = vmatpush.msra.mxu3 %v1420_v0 }
 0xb60   :  { %1046 = vmatpush.msra.mxu3 %v1422_v1 }
 0xb62   :  { %1047 = vmatpush.msra.mxu3 %v1428_v4 }
 0xb64   :  { %1048 = vmatpush.msra.mxu3 %v1433_v5 }
 0xb70   :  { %v710_v47 = vpop.permute.xlu0 %709 }
 0xb71   :  { %v712_v49 = vsel %vm125_vm2, %v706_v46, %v710_v47 }
 0xb72   :  { %1211 = vmatmul.msk.f32.vlgmr.msra.gmra.mxu2 %vm196_vm7, %v712_v49 }
 0xbe0   :  { %v792_v50 = vpop.f32.mrf.mxu3 }
 0xbe1   :  { %v795_v51 = vadd.f32 %v792_v50, %v117_v40 }
 0xbe3   :  { %1307 = vtanh.f32 %v795_v51  ;;  %v1214_v52 = vmul.f32 -1.442695, %v795_v51 }
 0xbe9   :  { %v1308_v30 = vpop.eup %1307 }
 0xbea   :  { %818 = vrot.lane.b32.xlu1 %v1308_v30, %s1394_s1 }
 0xbf5   :  { %v733_v0 = vpop.f32.mrf.mxu2 }
 0xbf6   :  { %v734_v1 = vadd.f32 %v1539_v48, %v733_v0 }
 0xbf8   :  { %1309 = vtanh.f32 %v734_v1  ;;  %v1212_v5 = vmul.f32 -1.442695, %v734_v1 }
 0xbfa   :  { %1311 = vpow2.f32 %v1212_v5 }
 0xbfb   :  { %1313 = vpow2.f32 %v1214_v52 }
 0xbfe   :  { %v1310_v4 = vpop.eup %1309 }
 0xbff   :  { %758 = vrot.lane.b32.xlu2 %v1310_v4, %s1394_s1 }
 0xc00   :  { %v1312_v53 = vpop.eup %1311 }
 0xc01   :  { %v1314_v54 = vpop.eup %1313  ;;  %v739_v7 = vadd.f32 1.0, %v1312_v53 }
 0xc02   :  { %v799_v33 = vadd.f32 1.0, %v1314_v54 }
 0xc03   :  { %1315 = vrcp.f32 %v739_v7  ;;  %v751_v39 = vand.u32 2147483648, %v739_v7  ;;  %vm745_vm15 = vweird.f32 %v739_v7  ;;  %v749_v42 = vand.u32 2147483647, %v739_v7 }
 0xc04   :  { %1317 = vrcp.f32 %v799_v33  ;;  %v811_v61 = vand.u32 2147483648, %v799_v33  ;;  %vm805_vm4 = vweird.f32 %v799_v33  ;;  %v809_v63 = vand.u32 2147483647, %v799_v33 }
 0xc05   :  { %v752_v62 = vor.u32 1.1754944e-38, %v751_v39  ;;  %vm750_vm5 = vcmp.eq.f32.partialorder %v749_v42, 8.507059e+37 }
 0xc06   :  { %v812_v9 = vor.u32 1.1754944e-38, %v811_v61  ;;  %vm810_vm8 = vcmp.eq.f32.partialorder %v809_v63, 8.507059e+37 }
 0xc09   :  { %v1316_v55 = vpop.eup %1315 }
 0xc0a   :  { %v1318_v34 = vpop.eup %1317  ;;  %v741_v56 = vmul.f32 %v1316_v55, %v739_v7  ;;  %vm746_vm14 = vweird.f32 %v1316_v55 }
 0xc0b   :  { %v801_v57 = vmul.f32 %v1318_v34, %v799_v33  ;;  %vm747_vm0 = vmor %vm745_vm15, %vm746_vm14  ;;  %vm806_vm3 = vweird.f32 %v1318_v34 }
 0xc0c   :  { %v742_v35 = vsub.f32 1.0, %v741_v56  ;;  %vm807_vm6 = vmor %vm805_vm4, %vm806_vm3 }
 0xc0d   :  { %v802_v58 = vsub.f32 1.0, %v801_v57 }
 0xc0e   :  { %v743_v36 = vmul.f32 %v1316_v55, %v742_v35 }
 0xc0f   :  { %v803_v37 = vmul.f32 %v1318_v34, %v802_v58 }
 0xc10   :  { %v744_v38 = vadd.f32 %v1316_v55, %v743_v36 }
 0xc11   :  { %v804_v59 = vadd.f32 %v1318_v34, %v803_v37 }
 0xc12   :  { %v748_v60 = vsel %vm747_vm0, %v1316_v55, %v744_v38 }
 0xc13   :  { %v753_v3 = vsel %vm750_vm5, %v752_v62, %v748_v60  ;;  %v808_v6 = vsel %vm807_vm6, %v1318_v34, %v804_v59 }
 0xc14   :  { %v813_v11 = vsel %vm810_vm8, %v812_v9, %v808_v6  ;;  %v756_v13 = vmul.f32 %v753_v3, %v1650_v24 }
 0xc15   :  { %v816_v16 = vmul.f32 %v813_v11, %v1654_v27 }
 0xc59   :  { %v759_v2 = vpop.permute.xlu2 %758 }
 0xc5a   :  { %v761_v8 = vmul.f32 %v759_v2, %v753_v3 }
 0xc5c   :  { %v819_v10 = vpop.permute.xlu1 %818  ;;  %763 = vrot.lane.b32.xlu1 %v761_v8, %s1395_s22 }
 0xc5d   :  { %v821_v12 = vmul.f32 %v819_v10, %v813_v11 }
 0xc5f   :  { %823 = vrot.lane.b32.xlu0 %v821_v12, %s1395_s22 }
 0xcce   :  { %v764_v14 = vpop.permute.xlu1 %763 }
 0xccf   :  { %v1679_v15 = vadd.f32 %v764_v14, %v756_v13 }
 0xcd1   :  { %1319 = vtanh.f32 %v1679_v15  ;;  %v824_v17 = vpop.permute.xlu0 %823 }
 0xcd2   :  { %v1683_v18 = vadd.f32 %v824_v17, %v816_v16  ;;  %v53_v16 = vld [vmem:[%s1749_s0 + $0x38] sm:$0xff]  ;;  %s1396_s0 = smov 96  }
 0xcd3   :  { %1192 = vmatmul.msk.f32.gmra.mxu0 %vm55_vm1, %v53_v16 }
 0xcd4   :  { %1321 = vtanh.f32 %v1683_v18 }
 0xcd7   :  { %v1320_v19 = vpop.eup %1319 }
 0xcd8   :  { %769 = vrot.lane.b32.xlu0 %v1320_v19, %s1394_s1 }
 0xcda   :  { %v1322_v20 = vpop.eup %1321 }
 0xcdb   :  { %829 = vrot.lane.b32.xlu2 %v1322_v20, %s1394_s1 }
 0xd35   :  { %v830_v21 = vpop.permute.xlu2 %829 }
 0xd36   :  { %v832_v22 = vmul.f32 %v830_v21, %v813_v11 }
 0xd38   :  { %834 = vrot.lane.b32.xlu1 %v832_v22, %s1395_s22 }
 0xd4a   :  { %v770_v23 = vpop.permute.xlu0 %769 }
 0xd4b   :  { %v772_v24 = vmul.f32 %v770_v23, %v753_v3 }
 0xd4d   :  { %838 = vrot.lane.b32.xlu2 %v772_v24, %s1394_s1 }
 0xd50   :  { %v122_v20 = vpop.f32.mrf.mxu0 }
 0xd51   :  { %v123_v21 = vadd.f32 %v1698_v45, %v122_v20 }
 0xda7   :  { %v839_v26 = vpop.permute.xlu2 %838 }
 0xdaa   :  { %v835_v27 = vpop.permute.xlu1 %834 }
 0xdab   :  { %v841_v32 = vsel %vm125_vm2, %v835_v27, %v839_v26  ;;  %1217 = vmatmul.msk.f32.vlgmr.msrb.gmra.mxu3 %vm125_vm2, %v835_v27 }
 0xdac   :  { %1215 = vmatmul.msk.f32.vlgmr.msrb.gmra.mxu1 %vm196_vm7, %v841_v32 }
 0xe29   :  { %v862_v43 = vpop.f32.mrf.mxu1 }
 0xe2a   :  { %v863_v31 = vadd.f32 %v1539_v48, %v862_v43 }
 0xe2c   :  { %1323 = vtanh.f32 %v863_v31  ;;  %v1216_v44 = vmul.f32 -1.442695, %v863_v31 }
 0xe2e   :  { %v921_v29 = vpop.f32.mrf.mxu3 }
 0xe2f   :  { %v924_v46 = vadd.f32 %v921_v29, %v120_v28 }
 0xe31   :  { %1325 = vtanh.f32 %v924_v46  ;;  %v1218_v40 = vmul.f32 -1.442695, %v924_v46 }
 0xe32   :  { %v1324_v47 = vpop.eup %1323  ;;  %1327 = vpow2.f32 %v1216_v44 }
 0xe33   :  { %887 = vrot.lane.b32.xlu0 %v1324_v47, %s1394_s1  ;;  %1329 = vpow2.f32 %v1218_v40 }
 0xe37   :  { %v1326_v49 = vpop.eup %1325 }
 0xe38   :  { %947 = vrot.lane.b32.xlu1 %v1326_v49, %s1394_s1  ;;  %v1328_v50 = vpop.eup %1327 }
 0xe39   :  { %v868_v48 = vadd.f32 1.0, %v1328_v50  ;;  %v1330_v51 = vpop.eup %1329 }
 0xe3a   :  { %v928_v30 = vadd.f32 1.0, %v1330_v51 }
 0xe3b   :  { %1331 = vrcp.f32 %v868_v48  ;;  %v880_v33 = vand.u32 2147483648, %v868_v48  ;;  %vm874_vm10 = vweird.f32 %v868_v48  ;;  %v878_v34 = vand.u32 2147483647, %v868_v48 }
 0xe3c   :  { %1333 = vrcp.f32 %v928_v30  ;;  %v940_v58 = vand.u32 2147483648, %v928_v30  ;;  %vm934_vm14 = vweird.f32 %v928_v30  ;;  %v938_v38 = vand.u32 2147483647, %v928_v30 }
 0xe3d   :  { %v881_v57 = vor.u32 1.1754944e-38, %v880_v33  ;;  %vm879_vm13 = vcmp.eq.f32.partialorder %v878_v34, 8.507059e+37 }
 0xe3e   :  { %v941_v59 = vor.u32 1.1754944e-38, %v940_v58  ;;  %vm939_vm0 = vcmp.eq.f32.partialorder %v938_v38, 8.507059e+37 }
 0xe41   :  { %v1332_v0 = vpop.eup %1331 }
 0xe42   :  { %v870_v1 = vmul.f32 %v1332_v0, %v868_v48  ;;  %v1334_v4 = vpop.eup %1333  ;;  %vm875_vm9 = vweird.f32 %v1332_v0 }
 0xe43   :  { %v930_v52 = vmul.f32 %v1334_v4, %v928_v30  ;;  %vm876_vm11 = vmor %vm874_vm10, %vm875_vm9  ;;  %vm935_vm12 = vweird.f32 %v1334_v4 }
 0xe44   :  { %v871_v5 = vsub.f32 1.0, %v870_v1  ;;  %vm936_vm15 = vmor %vm934_vm14, %vm935_vm12  ;;  %vm1177_vm14 = vcmask 7168  }
 0xe45   :  { %v931_v54 = vsub.f32 1.0, %v930_v52 }
 0xe46   :  { %v872_v53 = vmul.f32 %v1332_v0, %v871_v5 }
 0xe47   :  { %v932_v55 = vmul.f32 %v1334_v4, %v931_v54 }
 0xe48   :  { %v873_v7 = vadd.f32 %v1332_v0, %v872_v53 }
 0xe49   :  { %v933_v35 = vadd.f32 %v1334_v4, %v932_v55 }
 0xe4a   :  { %v877_v56 = vsel %vm876_vm11, %v1332_v0, %v873_v7 }
 0xe4b   :  { %v882_v37 = vsel %vm879_vm13, %v881_v57, %v877_v56  ;;  %v937_v42 = vsel %vm936_vm15, %v1334_v4, %v933_v35 }
 0xe4c   :  { %v942_v61 = vsel %vm939_vm0, %v941_v59, %v937_v42  ;;  %v885_v63 = vmul.f32 %v882_v37, %v1679_v15 }
 0xe4d   :  { %v945_v8 = vmul.f32 %v942_v61, %v1683_v18 }
 0xea5   :  { %v888_v36 = vpop.permute.xlu0 %887 }
 0xea6   :  { %v890_v39 = vmul.f32 %v888_v36, %v882_v37 }
 0xea8   :  { %892 = vrot.lane.b32.xlu2 %v890_v39, %s1395_s22 }
 0xeaa   :  { %v948_v60 = vpop.permute.xlu1 %947 }
 0xeab   :  { %v950_v62 = vmul.f32 %v948_v60, %v942_v61 }
 0xead   :  { %952 = vrot.lane.b32.xlu0 %v950_v62, %s1395_s22 }
 0xf02   :  { %v893_v2 = vpop.permute.xlu2 %892 }
 0xf03   :  { %v1706_v3 = vadd.f32 %v893_v2, %v885_v63 }
 0xf05   :  { %1335 = vtanh.f32 %v1706_v3 }
 0xf0b   :  { %v1336_v6 = vpop.eup %1335 }
 0xf0c   :  { %898 = vrot.lane.b32.xlu1 %v1336_v6, %s1394_s1 }
 0xf1f   :  { %v953_v9 = vpop.permute.xlu0 %952 }
 0xf20   :  { %v1711_v10 = vadd.f32 %v953_v9, %v945_v8 }
 0xf22   :  { %1337 = vtanh.f32 %v1711_v10 }
 0xf28   :  { %v1338_v11 = vpop.eup %1337 }
 0xf29   :  { %958 = vrot.lane.b32.xlu2 %v1338_v11, %s1394_s1 }
 0xf7e   :  { %v899_v12 = vpop.permute.xlu1 %898 }
 0xf7f   :  { %v901_v13 = vmul.f32 %v899_v12, %v882_v37 }
 0xf81   :  { %967 = vrot.lane.b32.xlu1 %v901_v13, %s1394_s1 }
 0xf83   :  { %v959_v14 = vpop.permute.xlu2 %958 }
 0xf84   :  { %v961_v15 = vmul.f32 %v959_v14, %v942_v61 }
 0xf86   :  { %963 = vrot.lane.b32.xlu0 %v961_v15, %s1395_s22 }
 0xff3   :  { %v968_v17 = vpop.permute.xlu1 %967 }
 0xff8   :  { %v964_v18 = vpop.permute.xlu0 %963 }
 0xff9   :  { %v970_v19 = vsel %vm125_vm2, %v964_v18, %v968_v17  ;;  %1221 = vmatmul.msk.f32.vlgmr.msra.gmra.mxu3 %vm125_vm2, %v964_v18 }
 0xffa   :  { %1219 = vmatmul.msk.f32.vlgmr.msrb.gmra.mxu2 %vm196_vm7, %v970_v19 }
0x107c   :  { %v1050_v22 = vpop.f32.mrf.mxu3 }
0x107d   :  { %v1053_v23 = vadd.f32 %v1050_v22, %v123_v21  ;;  %v991_v24 = vpop.f32.mrf.mxu2 }
0x107e   :  { %v992_v26 = vadd.f32 %v1725_v25, %v991_v24 }
0x107f   :  { %1339 = vtanh.f32 %v1053_v23  ;;  %v1222_v28 = vmul.f32 -1.442695, %v1053_v23 }
0x1080   :  { %1341 = vtanh.f32 %v992_v26  ;;  %v1220_v41 = vmul.f32 -1.442695, %v992_v26 }
0x1082   :  { %1343 = vpow2.f32 %v1220_v41 }
0x1085   :  { %v1340_v27 = vpop.eup %1339 }
0x1086   :  { %v1342_v32 = vpop.eup %1341  ;;  %1076 = vrot.lane.b32.xlu0 %v1340_v27, %s1394_s1 }
0x1087   :  { %1016 = vrot.lane.b32.xlu2 %v1342_v32, %s1394_s1  ;;  %v1233_v32 = vld [vmem:[#allocation2 + $0x78] ss:$0 sm:$0xff] }
0x1088   :  { %v1344_v43 = vpop.eup %1343 }
0x1089   :  { %v997_v31 = vadd.f32 1.0, %v1344_v43 }
0x108b   :  { %1345 = vrcp.f32 %v997_v31  ;;  %v1009_v50 = vand.u32 2147483648, %v997_v31  ;;  %vm1003_vm3 = vweird.f32 %v997_v31  ;;  %v1007_v48 = vand.u32 2147483647, %v997_v31 }
0x108c   :  { %1347 = vpow2.f32 %v1222_v28 }
0x108d   :  { %v1010_v30 = vor.u32 1.1754944e-38, %v1009_v50  ;;  %vm1008_vm5 = vcmp.eq.f32.partialorder %v1007_v48, 8.507059e+37 }
0x1091   :  { %v1346_v45 = vpop.eup %1345 }
0x1092   :  { %v999_v29 = vmul.f32 %v1346_v45, %v997_v31  ;;  %v1348_v47 = vpop.eup %1347  ;;  %vm1004_vm1 = vweird.f32 %v1346_v45 }
0x1093   :  { %v1057_v44 = vadd.f32 1.0, %v1348_v47  ;;  %vm1005_vm4 = vmor %vm1003_vm3, %vm1004_vm1 }
0x1094   :  { %v1000_v46 = vsub.f32 1.0, %v999_v29 }
0x1095   :  { %1349 = vrcp.f32 %v1057_v44  ;;  %v1069_v33 = vand.u32 2147483648, %v1057_v44  ;;  %vm1063_vm8 = vweird.f32 %v1057_v44  ;;  %v1067_v55 = vand.u32 2147483647, %v1057_v44 }
0x1096   :  { %v1001_v49 = vmul.f32 %v1346_v45, %v1000_v46 }
0x1097   :  { %v1070_v56 = vor.u32 1.1754944e-38, %v1069_v33  ;;  %vm1068_vm10 = vcmp.eq.f32.partialorder %v1067_v55, 8.507059e+37 }
0x1098   :  { %v1002_v40 = vadd.f32 %v1346_v45, %v1001_v49 }
0x109a   :  { %v1006_v51 = vsel %vm1005_vm4, %v1346_v45, %v1002_v40  ;;  %v1234_v40 = vld [vmem:[#allocation2 + $0x79] ss:$0 sm:$0xff] }
0x109b   :  { %v1011_v1 = vsel %vm1008_vm5, %v1010_v30, %v1006_v51  ;;  %v1350_v4 = vpop.eup %1349 }
0x109c   :  { %v1059_v52 = vmul.f32 %v1350_v4, %v1057_v44  ;;  %vm1064_vm6 = vweird.f32 %v1350_v4  ;;  %v1014_v38 = vmul.f32 %v1011_v1, %v1706_v3 }
0x109d   :  { %vm1065_vm9 = vmor %vm1063_vm8, %vm1064_vm6 }
0x109e   :  { %v1060_v53 = vsub.f32 1.0, %v1059_v52 }
0x10a0   :  { %v1061_v54 = vmul.f32 %v1350_v4, %v1060_v53 }
0x10a2   :  { %v1062_v7 = vadd.f32 %v1350_v4, %v1061_v54 }
0x10a4   :  { %v1066_v34 = vsel %vm1065_vm9, %v1350_v4, %v1062_v7 }
0x10a5   :  { %v1071_v35 = vsel %vm1068_vm10, %v1070_v56, %v1066_v34 }
0x10a6   :  { %v1074_v36 = vmul.f32 %v1071_v35, %v1711_v10 }
0x10e1   :  { %v1017_v0 = vpop.permute.xlu2 %1016 }
0x10e2   :  { %v1019_v5 = vmul.f32 %v1017_v0, %v1011_v1 }
0x10e4   :  { %1021 = vrot.lane.b32.xlu1 %v1019_v5, %s1395_s22 }
0x10f8   :  { %v1077_v57 = vpop.permute.xlu0 %1076 }
0x10f9   :  { %v1079_v58 = vmul.f32 %v1077_v57, %v1071_v35 }
0x10fb   :  { %1081 = vrot.lane.b32.xlu2 %v1079_v58, %s1395_s22 }
0x1155   :  { %v1082_v37 = vpop.permute.xlu2 %1081 }
0x1156   :  { %v1084_v39 = vadd.f32 %v1082_v37, %v1074_v36  ;;  %v1022_v42 = vpop.permute.xlu1 %1021 }
0x1157   :  { %v1024_v59 = vadd.f32 %v1022_v42, %v1014_v38 }
0x1158   :  { %1351 = vtanh.f32 %v1084_v39 }
0x1159   :  { %1353 = vtanh.f32 %v1024_v59 }
0x115e   :  { %v1352_v60 = vpop.eup %1351 }
0x115f   :  { %v1354_v61 = vpop.eup %1353  ;;  %1087 = vrot.lane.b32.xlu1 %v1352_v60, %s1394_s1 }
0x1160   :  { %1027 = vrot.lane.b32.xlu0 %v1354_v61, %s1394_s1 }
0x11d1   :  { %v1088_v62 = vpop.permute.xlu1 %1087 }
0x11d2   :  { %v1090_v63 = vmul.f32 %v1088_v62, %v1071_v35  ;;  %v1028_v2 = vpop.permute.xlu0 %1027 }
0x11d3   :  { %v1030_v6 = vmul.f32 %v1028_v2, %v1011_v1 }
0x11d4   :  { %1092 = vrot.lane.b32.xlu2 %v1090_v63, %s1395_s22 }
0x11d5   :  { %1096 = vrot.lane.b32.xlu0 %v1030_v6, %s1394_s1 }
0x122e   :  { %v1093_v3 = vpop.permute.xlu2 %1092 }
0x1247   :  { %v1097_v8 = vpop.permute.xlu0 %1096 }
0x1248   :  { %v1099_v9 = vsel %vm125_vm2, %v1093_v3, %v1097_v8 }
0x1249   :  { %1223 = vmatmul.msk.f32.vlgmr.msrb.gmra.mxu0 %vm196_vm7, %v1099_v9 }
0x12c6   :  { %v1120_v10 = vpop.f32.mrf.mxu0 }
0x12c7   :  { %v1121_v11 = vadd.f32 %v1725_v25, %v1120_v10 }
0x12c9   :  { %1355 = vtanh.f32 %v1121_v11  ;;  %v1224_v13 = vmul.f32 -1.442695, %v1121_v11 }
0x12cb   :  { %1357 = vpow2.f32 %v1224_v13 }
0x12cf   :  { %v1356_v12 = vpop.eup %1355 }
0x12d0   :  { %1145 = vrot.lane.b32.xlu1 %v1356_v12, %s1394_s1 }
0x12d1   :  { %v1358_v14 = vpop.eup %1357 }
0x12d2   :  { %v1126_v15 = vadd.f32 1.0, %v1358_v14 }
0x12d4   :  { %1359 = vrcp.f32 %v1126_v15  ;;  %v1138_v21 = vand.u32 2147483648, %v1126_v15  ;;  %vm1132_vm7 = vweird.f32 %v1126_v15  ;;  %v1136_v22 = vand.u32 2147483647, %v1126_v15 }
0x12d6   :  { %v1139_v24 = vor.u32 1.1754944e-38, %v1138_v21  ;;  %vm1137_vm13 = vcmp.eq.f32.partialorder %v1136_v22, 8.507059e+37 }
0x12d8   :  { %1164 = vrot.lane.b32.xlu1 %v1233_v32, %s1396_s0 }
0x12da   :  { %v1360_v16 = vpop.eup %1359 }
0x12db   :  { %v1128_v17 = vmul.f32 %v1360_v16, %v1126_v15  ;;  %vm1133_vm11 = vweird.f32 %v1360_v16 }
0x12dc   :  { %vm1134_vm12 = vmor %vm1132_vm7, %vm1133_vm11 }
0x12dd   :  { %v1129_v18 = vsub.f32 1.0, %v1128_v17 }
0x12df   :  { %v1130_v19 = vmul.f32 %v1360_v16, %v1129_v18 }
0x12e1   :  { %v1131_v20 = vadd.f32 %v1360_v16, %v1130_v19 }
0x12e3   :  { %v1135_v23 = vsel %vm1134_vm12, %v1360_v16, %v1131_v20 }
0x12e4   :  { %v1140_v26 = vsel %vm1137_vm13, %v1139_v24, %v1135_v23 }
0x12e5   :  { %v1143_v41 = vmul.f32 %v1140_v26, %v1024_v59 }
0x1342   :  { %v1146_v25 = vpop.permute.xlu1 %1145 }
0x1343   :  { %v1148_v27 = vmul.f32 %v1146_v25, %v1140_v26 }
0x1345   :  { %1150 = vrot.lane.b32.xlu2 %v1148_v27, %s1395_s22 }
0x134a   :  { %v1165_v29 = vpop.permute.xlu1 %1164 }
0x139f   :  { %v1151_v43 = vpop.permute.xlu2 %1150 }
0x13a0   :  { %v1153_v31 = vadd.f32 %v1151_v43, %v1143_v41 }
0x13a2   :  { %1361 = vtanh.f32 %v1153_v31 }
0x13a8   :  { %v1362_v45 = vpop.eup %1361 }
0x13a9   :  { %1156 = vrot.lane.b32.xlu0 %v1362_v45, %s1394_s1 }
0x141b   :  { %v1157_v28 = vpop.permute.xlu0 %1156 }
0x141c   :  { %v1159_v46 = vmul.f32 %v1157_v28, %v1140_v26 }
0x141e   :  { %v1167_v47 = vmul.f32 %v1165_v29, %v1159_v46 }
0x1420   :  { %1169 = vrot.lane.b32.xlu2 %v1167_v47, %s1395_s22 }
0x147a   :  { %v1170_v49 = vpop.permute.xlu2 %1169 }
0x147b   :  { %v1172_v44 = vsel %vm125_vm2, %v1170_v49, 0.0 }
0x147c   :  { %1173 = vadd.xlane.f32.xlu0 %v1172_v44 }
0x14ef   :  { %v1174_v50 = vpop.xlane.xlu0 %1173 }
0x14f0   :  { %v1176_v48 = vadd.f32 %v1234_v40, %v1174_v50 }
0x14f2   :  { %1178 = vst.msk [vmem:[%s1752_s3] sm:$0xff] %vm1177_vm14, %v1176_v48 }
0x14f3   :  { %1183 = vsyncpa [#allocation3], 1 }

</bundles_post_ra>
